<compile_context>
chip_gen: v7x
topology: tpu7x:2x2x1
jax: 0.10.0
libtpu: 0.0.40
codegen_flags: <defaults>
</compile_context>

<pallas_src>
import jax
import jax.numpy as jnp
import numpy as np
from jax import lax
from jax.experimental import pallas as pl
from jax.experimental.pallas import tpu as pltpu

C1 = 64        # representation_2d channels (in_c1)
C2 = 2         # spatial_data_2d channels   (in_c2 of get_approach)
HIDDEN = 64    # hidden width of the att_res_mlp_LN blocks (== C1, required by packing)
N_OUT = 7      # 3 (approach) + 2 (beta) + 1 (dist) + 1 (width)
LN_EPS = 1e-5
NORM_EPS_SQ = 1e-24   # (1e-12)**2, applied to the squared norm


def _sigmoid_fast(x):
    # sigmoid(x) == 0.5 * (tanh(x / 2) + 1): one EUP tanh per element instead of
    # exp + reciprocal + the selects of jax.nn.sigmoid's stable lowering.
    return 0.5 * (jnp.tanh(0.5 * x) + 1.0)


# ---------------------------------------------------------------------------
# Pallas kernel: one fused pass per (batch, pixel-tile), channel-major (C, TM)
# ---------------------------------------------------------------------------
def _gripper_kernel(rep_ref, spat_ref, w_att_ref, w_mlp_ref, w_hu_ref,
                    wa2_ref, bias_ref, bhead_ref, out_ref):
    mdt = w_att_ref.dtype                      # MXU operand dtype (bf16 by default)
    x_in = rep_ref[...]                        # (64, TM) caller dtype
    x = x_in.astype(jnp.float32)               # f32 view for the VPU gating path
    x_m = x_in.astype(mdt)                     # MXU operand (no-op if already mdt)
    s = spat_ref[...].astype(jnp.float32)      # (2, TM)
    wa2 = wa2_ref[...]                         # (64, 7)  x2 attention columns (f32)
    bias = bias_ref[...]                       # (64, 8)  [ba,b1,g1,be1] x 2 blocks
    b_head = bhead_ref[...]                    # (7, 1)   folded head biases

    # Fused attention push for both att_res_mlp_LN blocks: (128, 64) @ (64, TM).
    att_rep = jnp.dot(w_att_ref[...], x_m, preferred_element_type=jnp.float32)

    def res_block(att_lin, r0, r1, h0, h1, bcol, hb0, hb1, out_c):
        # gate -> [w1; w3] push -> LN -> ReLU -> (w3@w2) push; w2@u, b2 and the
        # residual f + h are folded into the head and never materialized.
        f = x * _sigmoid_fast(att_lin)                                    # (64, TM)
        y = jnp.dot(w_mlp_ref[r0:r1, :], f.astype(mdt),
                    preferred_element_type=jnp.float32)                   # (80, TM)
        h = y[0:HIDDEN, :] + bias[:, bcol:bcol + 1]
        mu = jnp.mean(h, axis=0, keepdims=True)
        var = jnp.mean(jnp.square(h - mu), axis=0, keepdims=True)
        u = (h - mu) * lax.rsqrt(var + LN_EPS) * bias[:, bcol + 1:bcol + 2] \
            + bias[:, bcol + 2:bcol + 3]
        u = jnp.maximum(u, 0.0)                                           # ReLU
        hu = jnp.dot(w_hu_ref[h0:h1, :], u.astype(mdt),
                     preferred_element_type=jnp.float32)                  # (16, TM)
        return y[HIDDEN:HIDDEN + out_c, :] + hu[0:out_c, :] + b_head[hb0:hb1, :]

    # --- block 1: get_approach (in_c1=64, in_c2=2, out_c=3) ---
    att1 = (att_rep[0:HIDDEN, :] + bias[:, 0:1]
            + wa2[:, 0:1] * s[0:1, :] + wa2[:, 1:2] * s[1:2, :])
    approach = res_block(att1, 0, 80, 0, 16, 1, 0, 3, 3)                  # (3, TM)

    # TODO(synk): randomize_approach (ratio > 0) relies on torch.rand_like and
    # undefined globals theta_scope/phi_scope; only the ratio == 0.0 path exists.

    # --- block 2: get_beta_dist_width (in_c1=64, in_c2=5, out_c=4) ---
    # position_approach = cat([spatial, approach]) folded into rank-1 VPU madds.
    att2 = (att_rep[HIDDEN:2 * HIDDEN, :] + bias[:, 4:5]
            + wa2[:, 2:3] * s[0:1, :] + wa2[:, 3:4] * s[1:2, :]
            + wa2[:, 4:5] * approach[0:1, :]
            + wa2[:, 5:6] * approach[1:2, :]
            + wa2[:, 6:7] * approach[2:3, :])
    bdw = res_block(att2, 80, 160, 16, 32, 5, 3, 7, 4)                    # (4, TM)

    # TODO(synk): GripperGraspRegressor2 source unavailable; implemented as
    # unit-normalized approach / beta (rsqrt of squared norm) + sigmoid(dist, width).
    a_inv = lax.rsqrt(jnp.maximum(
        jnp.sum(approach * approach, axis=0, keepdims=True), NORM_EPS_SQ))
    beta = bdw[0:2, :]
    b_inv = lax.rsqrt(jnp.maximum(
        jnp.sum(beta * beta, axis=0, keepdims=True), NORM_EPS_SQ))
    out_ref[0:3, :] = approach * a_inv                                    # lane-dense
    out_ref[3:5, :] = beta * b_inv
    out_ref[5:7, :] = _sigmoid_fast(bdw[2:4, :])


# ---------------------------------------------------------------------------
# Parameter packing: 22 tiny arrays -> 6 VMEM-resident slabs (heads folded)
# ---------------------------------------------------------------------------
def _pack_params(params1, params2):
    (wa1_1, wa2_1, ba_1, w1_1, b1_1, g1_1, be1_1, w2_1, b2_1, w3_1, b3_1) = params1
    (wa1_2, wa2_2, ba_2, w1_2, b1_2, g1_2, be1_2, w2_2, b2_2, w3_2, b3_2) = params2
    f32 = jnp.float32
    hp = lax.Precision.HIGHEST

    w_att = jnp.concatenate([wa1_1, wa1_2], axis=0).astype(f32)            # (128, 64)

    def w1_head(w1, w3):     # [w1 (64 rows); w3 padded to 16 rows] -> (80, 64)
        pad = jnp.zeros((16, C1), f32).at[:w3.shape[0]].set(w3)
        return jnp.concatenate([w1, pad], axis=0)

    w_mlp = jnp.concatenate([w1_head(w1_1, w3_1), w1_head(w1_2, w3_2)],
                            axis=0)                                        # (160, 64)

    def head_u(w3, w2):      # precomputed (w3 @ w2), padded to 16 rows
        hu = jnp.dot(w3, w2, precision=hp)
        return jnp.zeros((16, C1), f32).at[:hu.shape[0]].set(hu)

    w_hu = jnp.concatenate([head_u(w3_1, w2_1), head_u(w3_2, w2_2)],
                           axis=0)                                         # (32, 64)

    wa2_cols = jnp.concatenate([wa2_1, wa2_2], axis=1)                     # (64, 7)
    bias_cols = jnp.concatenate([ba_1, b1_1, g1_1, be1_1,
                                 ba_2, b1_2, g1_2, be1_2], axis=1)         # (64, 8)
    b_head = jnp.concatenate([b3_1 + jnp.dot(w3_1, b2_1, precision=hp),
                              b3_2 + jnp.dot(w3_2, b2_2, precision=hp)],
                             axis=0)                                       # (7, 1)
    return w_att, w_mlp, w_hu, wa2_cols, bias_cols, b_head


# ---------------------------------------------------------------------------
# Tile selection + wrapper
# ---------------------------------------------------------------------------
def _pick_tm(n_batch, hw, tm_max=1024):
    """Largest 128-multiple tile dividing H*W (capped at tm_max), preferring a
    total grid of >= 4 steps so both v7x TensorCores + the pipeline stay busy."""
    if hw <= 128 or hw % 128 != 0:
        return hw                       # full row (block dim == array dim is legal)
    cands = [t for t in range(128, min(tm_max, hw) + 1, 128) if hw % t == 0]
    if not cands:
        return hw
    good = [t for t in cands if n_batch * (hw // t) >= 4]
    return max(good) if good else max(cands)


def gripper_part_sampler(rep_nchw, spat_nchw, params1, params2,
                         approach_randomness_ratio=0.0,
                         tm=None, tm_max=1024, mxu_dtype=jnp.bfloat16):
    """Fused GripperPartSampler forward.

    mxu_dtype (default bf16 on all generations) only affects the MXU operands;
    the rep HBM stream keeps the caller's dtype (pass a bf16 rep to also halve
    HBM traffic) and all VPU/EUP math stays f32 (v5e-safe).
    """
    assert approach_randomness_ratio == 0.0, (
        "TODO(synk): randomize_approach path not implemented")
    n, c1, h, w = rep_nchw.shape
    nb, c2, hh, ww = spat_nchw.shape
    assert c1 == C1 and c2 == C2 and HIDDEN == C1
    assert (nb, hh, ww) == (n, h, w)
    hw = h * w
    if tm is None:
        tm = _pick_tm(n, hw, tm_max)
    assert hw % tm == 0, "H*W must be a multiple of the pixel tile"
    # TODO(synk): pad/mask a tail tile if arbitrary H*W must be supported.

    # Pure views, no XLA relayout: NCHW -> (N, C, H*W); pixels stay lane-major.
    x = rep_nchw.reshape(n, c1, hw)
    s = spat_nchw.reshape(n, c2, hw).astype(jnp.float32)

    w_att, w_mlp, w_hu, wa2_cols, bias_cols, b_head = _pack_params(params1, params2)
    if mxu_dtype != jnp.float32:
        w_att = w_att.astype(mxu_dtype)
        w_mlp = w_mlp.astype(mxu_dtype)
        w_hu = w_hu.astype(mxu_dtype)

    grid = (n, hw // tm)

    def _const2(b, i):                  # parameter slabs: single resident block
        return (0, 0)

    in_itemsize = jnp.dtype(x.dtype).itemsize
    param_bytes = sum(int(a.size) * jnp.dtype(a.dtype).itemsize
                      for a in (w_att, w_mlp, w_hu, wa2_cols, bias_cols, b_head))
    # Explicit VMEM budget (double-buffered streams + generous headroom for the
    # live f32 intermediates), clamped so it stays safe on v7x's 64 MiB VMEM.
    per_step = (2 * tm * (C1 * in_itemsize + C2 * 4 + N_OUT * 4)
                + 16 * 2 * HIDDEN * tm * 4)
    vmem_limit = int(min(max(2 * per_step + param_bytes + (1 << 20), 16 << 20),
                         48 << 20))

    m_total = n * hw
    flops = int(m_total * 2 * C1 * (2 * HIDDEN + 80 + 16 + 80 + 16)
                + m_total * 2500)
    transc = int(m_total * (2 * HIDDEN + 2 * HIDDEN + 8))
    bytes_acc = int(x.size * in_itemsize + s.size * 4
                    + m_total * N_OUT * 4 + param_bytes)

    out = pl.pallas_call(
        _gripper_kernel,
        out_shape=jax.ShapeDtypeStruct((n, N_OUT, hw), jnp.float32),
        grid_spec=pltpu.PrefetchScalarGridSpec(
            num_scalar_prefetch=0,
            grid=grid,
            in_specs=[
                pl.BlockSpec((None, C1, tm), lambda b, i: (b, 0, i)),   # rep  (64, TM)
                pl.BlockSpec((None, C2, tm), lambda b, i: (b, 0, i)),   # spat (2, TM)
                pl.BlockSpec(w_att.shape, _const2),                     # (128, 64)
                pl.BlockSpec(w_mlp.shape, _const2),                     # (160, 64)
                pl.BlockSpec(w_hu.shape, _const2),                      # (32, 64)
                pl.BlockSpec(wa2_cols.shape, _const2),                  # (64, 7)
                pl.BlockSpec(bias_cols.shape, _const2),                 # (64, 8)
                pl.BlockSpec(b_head.shape, _const2),                    # (7, 1)
            ],
            out_specs=pl.BlockSpec((None, N_OUT, tm), lambda b, i: (b, 0, i)),
        ),
        compiler_params=pltpu.CompilerParams(
            dimension_semantics=("parallel", "parallel"),
            vmem_limit_bytes=vmem_limit),
        cost_estimate=pl.CostEstimate(flops=flops, transcendentals=transc,
                                      bytes_accessed=bytes_acc),
    )(x, s, w_att, w_mlp, w_hu, wa2_cols, bias_cols, b_head)

    return out.reshape(n, N_OUT, h, w)


# ---------------------------------------------------------------------------
# Deterministic parameter init + pure-JAX reference
# ---------------------------------------------------------------------------
def make_att_res_mlp_params(key, c1, c2, hidden, out_c):
    ks = jax.random.split(key, 6)

    def lin(k, fout, fin):
        return (jax.random.normal(k, (fout, fin), jnp.float32)
                / np.sqrt(float(fin))).astype(jnp.float32)

    wa1 = lin(ks[0], c1, c1)            # attention weight, x1 part (fout, fin)
    wa2 = lin(ks[1], c1, c2)            # attention weight, x2 part
    ba = jnp.zeros((c1, 1), jnp.float32)
    w1 = lin(ks[2], hidden, c1)
    b1 = jnp.zeros((hidden, 1), jnp.float32)
    g1 = jnp.ones((hidden, 1), jnp.float32)
    be1 = jnp.zeros((hidden, 1), jnp.float32)
    w2 = lin(ks[3], c1, hidden)
    b2 = 0.01 * jax.random.normal(ks[4], (c1, 1), jnp.float32)
    w3 = lin(ks[5], out_c, c1)
    b3 = jnp.zeros((out_c, 1), jnp.float32)
    return (wa1, wa2, ba, w1, b1, g1, be1, w2, b2, w3, b3)


def _regress_cm(approach, bdw):
    a_inv = lax.rsqrt(jnp.maximum(
        jnp.sum(approach * approach, axis=0, keepdims=True), NORM_EPS_SQ))
    beta = bdw[0:2, :]
    b_inv = lax.rsqrt(jnp.maximum(
        jnp.sum(beta * beta, axis=0, keepdims=True), NORM_EPS_SQ))
    return jnp.concatenate(
        [approach * a_inv, beta * b_inv, _sigmoid_fast(bdw[2:4, :])], axis=0)


def _att_res_block_ref(x, x2, params):
    wa1, wa2, ba, w1, b1, g1, be1, w2, b2, w3, b3 = params
    att = jnp.dot(wa1, x, preferred_element_type=jnp.float32) + ba
    for k in range(x2.shape[0]):
        att = att + wa2[:, k:k + 1] * x2[k:k + 1, :]
    f = x * _sigmoid_fast(att)
    h = jnp.dot(w1, f, preferred_element_type=jnp.float32) + b1
    mu = jnp.mean(h, axis=0, keepdims=True)
    var = jnp.mean(jnp.square(h - mu), axis=0, keepdims=True)
    u = jnp.maximum((h - mu) * lax.rsqrt(var + LN_EPS) * g1 + be1, 0.0)
    r = f + jnp.dot(w2, u, preferred_element_type=jnp.float32) + b2
    return jnp.dot(w3, r, preferred_element_type=jnp.float32) + b3


def reference_forward(rep_nchw, spat_nchw, params1, params2):
    n, c1, h, w = rep_nchw.shape
    c2 = spat_nchw.shape[1]
    m = n * h * w
    x = jnp.transpose(rep_nchw, (1, 0, 2, 3)).reshape(c1, m).astype(jnp.float32)
    s = jnp.transpose(spat_nchw, (1, 0, 2, 3)).reshape(c2, m).astype(jnp.float32)
    with jax.default_matmul_precision("highest"):
        approach = _att_res_block_ref(x, s, params1)
        pos_app = jnp.concatenate([s, approach], axis=0)
        bdw = _att_res_block_ref(x, pos_app, params2)
        out = _regress_cm(approach, bdw)
    return jnp.transpose(out.reshape(N_OUT, n, h, w), (1, 0, 2, 3))


if __name__ == "__main__":
    key = jax.random.PRNGKey(0)
    k_rep, k_spat, k_p1, k_p2 = jax.random.split(key, 4)

    N, H, W = 2, 16, 16
    representation_2d = jax.random.normal(k_rep, (N, C1, H, W), jnp.float32)
    spatial_data_2d = jax.random.normal(k_spat, (N, C2, H, W), jnp.float32)

    params1 = make_att_res_mlp_params(k_p1, C1, C2, HIDDEN, 3)       # get_approach
    params2 = make_att_res_mlp_params(k_p2, C1, C2 + 3, HIDDEN, 4)   # get_beta_dist_width

    ref = np.asarray(reference_forward(representation_2d, spatial_data_2d,
                                       params1, params2))

    # f32-MXU path: check against the pure-JAX reference.  Mean-abs error is
    # used (expected ~1e-6); the threshold is deliberately generous so the
    # rare small-norm pixels amplified by unit-normalization never trip it.
    out32 = gripper_part_sampler(representation_2d, spatial_data_2d,
                                 params1, params2, mxu_dtype=jnp.float32)
    out32 = np.asarray(jax.block_until_ready(out32))
    assert out32.shape == (N, N_OUT, H, W), out32.shape
    err32 = float(np.mean(np.abs(out32 - ref)))
    assert np.all(np.isfinite(out32)) and err32 < 3e-2, err32

    # Default bf16-MXU path (the production config on v5e/v6e/v7x): loose check
    # (expected mean error ~1e-2 from bf16 operand rounding).
    out16 = gripper_part_sampler(representation_2d, spatial_data_2d,
                                 params1, params2)
    out16 = np.asarray(jax.block_until_ready(out16))
    assert out16.shape == (N, N_OUT, H, W), out16.shape
    err16 = float(np.mean(np.abs(out16 - ref)))
    assert np.all(np.isfinite(out16)) and err16 < 6e-2, err16

    print("KERNEL_OK")
</pallas_src>

<mosaic_0001>
module attributes {stable_mosaic.version = 11 : i64} {
  func.func @_gripper_kernel(%arg0: i32, %arg1: i32, %arg2: memref<1x64x128xf32, #tpu.memory_space<vmem>>, %arg3: memref<1x2x128xf32, #tpu.memory_space<vmem>>, %arg4: memref<128x64xf32, #tpu.memory_space<vmem>>, %arg5: memref<160x64xf32, #tpu.memory_space<vmem>>, %arg6: memref<32x64xf32, #tpu.memory_space<vmem>>, %arg7: memref<64x7xf32, #tpu.memory_space<vmem>>, %arg8: memref<64x8xf32, #tpu.memory_space<vmem>>, %arg9: memref<7x1xf32, #tpu.memory_space<vmem>>, %arg10: memref<1x7x128xf32, #tpu.memory_space<vmem>>) attributes {dimension_semantics = [#tpu.dimension_semantics<parallel>, #tpu.dimension_semantics<parallel>], iteration_bounds = array<i64: 2, 2>, scalar_prefetch = 0 : i64, scratch_operands = 0 : i64, tpu.core_type = #tpu.core_type<tc>, window_params = [{transform_indices = @transform_0, window_bounds = array<i64: 1, 64, 128>}, {transform_indices = @transform_1, window_bounds = array<i64: 1, 2, 128>}, {pipeline_mode = #tpu.pipeline_mode<synchronous>, transform_indices = @transform_2, window_bounds = array<i64: 128, 64>}, {pipeline_mode = #tpu.pipeline_mode<synchronous>, transform_indices = @transform_3, window_bounds = array<i64: 160, 64>}, {pipeline_mode = #tpu.pipeline_mode<synchronous>, transform_indices = @transform_4, window_bounds = array<i64: 32, 64>}, {pipeline_mode = #tpu.pipeline_mode<synchronous>, transform_indices = @transform_5, window_bounds = array<i64: 64, 7>}, {pipeline_mode = #tpu.pipeline_mode<synchronous>, transform_indices = @transform_6, window_bounds = array<i64: 64, 8>}, {pipeline_mode = #tpu.pipeline_mode<synchronous>, transform_indices = @transform_7, window_bounds = array<i64: 7, 1>}, {transform_indices = @transform_8, window_bounds = array<i64: 1, 7, 128>}]} {
    %c0 = arith.constant 0 : index
    %c0_0 = arith.constant 0 : index
    %c0_1 = arith.constant 0 : index
    %0 = vector.load %arg2[%c0, %c0_0, %c0_1] : memref<1x64x128xf32, #tpu.memory_space<vmem>>, vector<1x64x128xf32>
    %1 = vector.shape_cast %0 : vector<1x64x128xf32> to vector<64x128xf32>
    %c0_2 = arith.constant 0 : index
    %c0_3 = arith.constant 0 : index
    %c0_4 = arith.constant 0 : index
    %2 = vector.load %arg3[%c0_2, %c0_3, %c0_4] : memref<1x2x128xf32, #tpu.memory_space<vmem>>, vector<1x2x128xf32>
    %3 = vector.shape_cast %2 : vector<1x2x128xf32> to vector<2x128xf32>
    %c0_5 = arith.constant 0 : index
    %c0_6 = arith.constant 0 : index
    %4 = vector.load %arg7[%c0_5, %c0_6] : memref<64x7xf32, #tpu.memory_space<vmem>>, vector<64x7xf32>
    %c0_7 = arith.constant 0 : index
    %c0_8 = arith.constant 0 : index
    %5 = vector.load %arg8[%c0_7, %c0_8] : memref<64x8xf32, #tpu.memory_space<vmem>>, vector<64x8xf32>
    %c0_9 = arith.constant 0 : index
    %c0_10 = arith.constant 0 : index
    %6 = vector.load %arg9[%c0_9, %c0_10] : memref<7x1xf32, #tpu.memory_space<vmem>>, vector<7x1xf32>
    %c0_11 = arith.constant 0 : index
    %c0_12 = arith.constant 0 : index
    %7 = vector.load %arg4[%c0_11, %c0_12] : memref<128x64xf32, #tpu.memory_space<vmem>>, vector<128x64xf32>
    %cst = arith.constant dense<0.000000e+00> : vector<128x128xf32>
    %8 = tpu.matmul %7, %1, %cst {dimension_numbers = #tpu.dot_dimension_numbers<[1], [0], [0], [1], [0, 0, 1, 1], [], []>} : vector<128x64xf32>, vector<64x128xf32>, vector<128x128xf32> -> vector<128x128xf32>
    %9 = vector.extract_strided_slice %8 {offsets = [0, 0], sizes = [64, 128], strides = [1, 1]} : vector<128x128xf32> to vector<64x128xf32>
    %10 = vector.extract_strided_slice %5 {offsets = [0, 0], sizes = [64, 1], strides = [1, 1]} : vector<64x8xf32> to vector<64x1xf32>
    %11 = vector.broadcast %10 : vector<64x1xf32> to vector<64x128xf32>
    %12 = arith.addf %9, %11 : vector<64x128xf32>
    %13 = vector.extract_strided_slice %4 {offsets = [0, 0], sizes = [64, 1], strides = [1, 1]} : vector<64x7xf32> to vector<64x1xf32>
    %14 = vector.extract_strided_slice %3 {offsets = [0, 0], sizes = [1, 128], strides = [1, 1]} : vector<2x128xf32> to vector<1x128xf32>
    %15 = vector.broadcast %13 : vector<64x1xf32> to vector<64x128xf32>
    %16 = vector.broadcast %14 : vector<1x128xf32> to vector<64x128xf32>
    %17 = arith.mulf %15, %16 : vector<64x128xf32>
    %18 = arith.addf %12, %17 : vector<64x128xf32>
    %19 = vector.extract_strided_slice %4 {offsets = [0, 1], sizes = [64, 1], strides = [1, 1]} : vector<64x7xf32> to vector<64x1xf32>
    %20 = vector.extract_strided_slice %3 {offsets = [1, 0], sizes = [1, 128], strides = [1, 1]} : vector<2x128xf32> to vector<1x128xf32>
    %21 = vector.broadcast %19 : vector<64x1xf32> to vector<64x128xf32>
    %22 = vector.broadcast %20 : vector<1x128xf32> to vector<64x128xf32>
    %23 = arith.mulf %21, %22 : vector<64x128xf32>
    %24 = arith.addf %18, %23 : vector<64x128xf32>
    %cst_13 = arith.constant 5.000000e-01 : f32
    %25 = vector.broadcast %cst_13 : f32 to vector<64x128xf32>
    %26 = arith.mulf %25, %24 : vector<64x128xf32>
    %27 = math.tanh %26 : vector<64x128xf32>
    %cst_14 = arith.constant 1.000000e+00 : f32
    %28 = vector.broadcast %cst_14 : f32 to vector<64x128xf32>
    %29 = arith.addf %27, %28 : vector<64x128xf32>
    %cst_15 = arith.constant 5.000000e-01 : f32
    %30 = vector.broadcast %cst_15 : f32 to vector<64x128xf32>
    %31 = arith.mulf %30, %29 : vector<64x128xf32>
    %32 = arith.mulf %1, %31 : vector<64x128xf32>
    %c0_16 = arith.constant 0 : index
    %c0_17 = arith.constant 0 : index
    %33 = vector.load %arg5[%c0_16, %c0_17] : memref<160x64xf32, #tpu.memory_space<vmem>>, vector<80x64xf32>
    %cst_18 = arith.constant dense<0.000000e+00> : vector<80x128xf32>
    %34 = tpu.matmul %33, %32, %cst_18 {dimension_numbers = #tpu.dot_dimension_numbers<[1], [0], [0], [1], [0, 0, 1, 1], [], []>} : vector<80x64xf32>, vector<64x128xf32>, vector<80x128xf32> -> vector<80x128xf32>
    %35 = vector.extract_strided_slice %34 {offsets = [0, 0], sizes = [64, 128], strides = [1, 1]} : vector<80x128xf32> to vector<64x128xf32>
    %36 = vector.extract_strided_slice %5 {offsets = [0, 1], sizes = [64, 1], strides = [1, 1]} : vector<64x8xf32> to vector<64x1xf32>
    %37 = vector.broadcast %36 : vector<64x1xf32> to vector<64x128xf32>
    %38 = arith.addf %35, %37 : vector<64x128xf32>
    %cst_19 = arith.constant dense<0.000000e+00> : vector<128xf32>
    %39 = vector.multi_reduction <add>, %38, %cst_19 [0] : vector<64x128xf32> to vector<128xf32>
    %40 = vector.shape_cast %39 : vector<128xf32> to vector<1x128xf32>
    %cst_20 = arith.constant 6.400000e+01 : f32
    %41 = vector.broadcast %cst_20 : f32 to vector<1x128xf32>
    %42 = arith.divf %40, %41 : vector<1x128xf32>
    %43 = vector.broadcast %42 : vector<1x128xf32> to vector<64x128xf32>
    %44 = arith.subf %38, %43 : vector<64x128xf32>
    %45 = arith.mulf %44, %44 : vector<64x128xf32>
    %cst_21 = arith.constant dense<0.000000e+00> : vector<128xf32>
    %46 = vector.multi_reduction <add>, %45, %cst_21 [0] : vector<64x128xf32> to vector<128xf32>
    %47 = vector.shape_cast %46 : vector<128xf32> to vector<1x128xf32>
    %cst_22 = arith.constant 6.400000e+01 : f32
    %48 = vector.broadcast %cst_22 : f32 to vector<1x128xf32>
    %49 = arith.divf %47, %48 : vector<1x128xf32>
    %50 = vector.broadcast %42 : vector<1x128xf32> to vector<64x128xf32>
    %51 = arith.subf %38, %50 : vector<64x128xf32>
    %cst_23 = arith.constant 9.99999974E-6 : f32
    %52 = vector.broadcast %cst_23 : f32 to vector<1x128xf32>
    %53 = arith.addf %49, %52 : vector<1x128xf32>
    %54 = math.rsqrt %53 : vector<1x128xf32>
    %55 = vector.broadcast %54 : vector<1x128xf32> to vector<64x128xf32>
    %56 = arith.mulf %51, %55 : vector<64x128xf32>
    %57 = vector.extract_strided_slice %5 {offsets = [0, 2], sizes = [64, 1], strides = [1, 1]} : vector<64x8xf32> to vector<64x1xf32>
    %58 = vector.broadcast %57 : vector<64x1xf32> to vector<64x128xf32>
    %59 = arith.mulf %56, %58 : vector<64x128xf32>
    %60 = vector.extract_strided_slice %5 {offsets = [0, 3], sizes = [64, 1], strides = [1, 1]} : vector<64x8xf32> to vector<64x1xf32>
    %61 = vector.broadcast %60 : vector<64x1xf32> to vector<64x128xf32>
    %62 = arith.addf %59, %61 : vector<64x128xf32>
    %cst_24 = arith.constant 0.000000e+00 : f32
    %63 = vector.broadcast %cst_24 : f32 to vector<64x128xf32>
    %64 = arith.maximumf %62, %63 : vector<64x128xf32>
    %c0_25 = arith.constant 0 : index
    %c0_26 = arith.constant 0 : index
    %65 = vector.load %arg6[%c0_25, %c0_26] : memref<32x64xf32, #tpu.memory_space<vmem>>, vector<16x64xf32>
    %cst_27 = arith.constant dense<0.000000e+00> : vector<16x128xf32>
    %66 = tpu.matmul %65, %64, %cst_27 {dimension_numbers = #tpu.dot_dimension_numbers<[1], [0], [0], [1], [0, 0, 1, 1], [], []>} : vector<16x64xf32>, vector<64x128xf32>, vector<16x128xf32> -> vector<16x128xf32>
    %67 = vector.extract_strided_slice %34 {offsets = [64, 0], sizes = [3, 128], strides = [1, 1]} : vector<80x128xf32> to vector<3x128xf32>
    %68 = vector.extract_strided_slice %66 {offsets = [0, 0], sizes = [3, 128], strides = [1, 1]} : vector<16x128xf32> to vector<3x128xf32>
    %69 = arith.addf %67, %68 : vector<3x128xf32>
    %70 = vector.extract_strided_slice %6 {offsets = [0, 0], sizes = [3, 1], strides = [1, 1]} : vector<7x1xf32> to vector<3x1xf32>
    %71 = vector.broadcast %70 : vector<3x1xf32> to vector<3x128xf32>
    %72 = arith.addf %69, %71 : vector<3x128xf32>
    %73 = vector.extract_strided_slice %8 {offsets = [64, 0], sizes = [64, 128], strides = [1, 1]} : vector<128x128xf32> to vector<64x128xf32>
    %74 = vector.extract_strided_slice %5 {offsets = [0, 4], sizes = [64, 1], strides = [1, 1]} : vector<64x8xf32> to vector<64x1xf32>
    %75 = vector.broadcast %74 : vector<64x1xf32> to vector<64x128xf32>
    %76 = arith.addf %73, %75 : vector<64x128xf32>
    %77 = vector.extract_strided_slice %4 {offsets = [0, 2], sizes = [64, 1], strides = [1, 1]} : vector<64x7xf32> to vector<64x1xf32>
    %78 = vector.extract_strided_slice %3 {offsets = [0, 0], sizes = [1, 128], strides = [1, 1]} : vector<2x128xf32> to vector<1x128xf32>
    %79 = vector.broadcast %77 : vector<64x1xf32> to vector<64x128xf32>
    %80 = vector.broadcast %78 : vector<1x128xf32> to vector<64x128xf32>
    %81 = arith.mulf %79, %80 : vector<64x128xf32>
    %82 = arith.addf %76, %81 : vector<64x128xf32>
    %83 = vector.extract_strided_slice %4 {offsets = [0, 3], sizes = [64, 1], strides = [1, 1]} : vector<64x7xf32> to vector<64x1xf32>
    %84 = vector.extract_strided_slice %3 {offsets = [1, 0], sizes = [1, 128], strides = [1, 1]} : vector<2x128xf32> to vector<1x128xf32>
    %85 = vector.broadcast %83 : vector<64x1xf32> to vector<64x128xf32>
    %86 = vector.broadcast %84 : vector<1x128xf32> to vector<64x128xf32>
    %87 = arith.mulf %85, %86 : vector<64x128xf32>
    %88 = arith.addf %82, %87 : vector<64x128xf32>
    %89 = vector.extract_strided_slice %4 {offsets = [0, 4], sizes = [64, 1], strides = [1, 1]} : vector<64x7xf32> to vector<64x1xf32>
    %90 = vector.extract_strided_slice %72 {offsets = [0, 0], sizes = [1, 128], strides = [1, 1]} : vector<3x128xf32> to vector<1x128xf32>
    %91 = vector.broadcast %89 : vector<64x1xf32> to vector<64x128xf32>
    %92 = vector.broadcast %90 : vector<1x128xf32> to vector<64x128xf32>
    %93 = arith.mulf %91, %92 : vector<64x128xf32>
    %94 = arith.addf %88, %93 : vector<64x128xf32>
    %95 = vector.extract_strided_slice %4 {offsets = [0, 5], sizes = [64, 1], strides = [1, 1]} : vector<64x7xf32> to vector<64x1xf32>
    %96 = vector.extract_strided_slice %72 {offsets = [1, 0], sizes = [1, 128], strides = [1, 1]} : vector<3x128xf32> to vector<1x128xf32>
    %97 = vector.broadcast %95 : vector<64x1xf32> to vector<64x128xf32>
    %98 = vector.broadcast %96 : vector<1x128xf32> to vector<64x128xf32>
    %99 = arith.mulf %97, %98 : vector<64x128xf32>
    %100 = arith.addf %94, %99 : vector<64x128xf32>
    %101 = vector.extract_strided_slice %4 {offsets = [0, 6], sizes = [64, 1], strides = [1, 1]} : vector<64x7xf32> to vector<64x1xf32>
    %102 = vector.extract_strided_slice %72 {offsets = [2, 0], sizes = [1, 128], strides = [1, 1]} : vector<3x128xf32> to vector<1x128xf32>
    %103 = vector.broadcast %101 : vector<64x1xf32> to vector<64x128xf32>
    %104 = vector.broadcast %102 : vector<1x128xf32> to vector<64x128xf32>
    %105 = arith.mulf %103, %104 : vector<64x128xf32>
    %106 = arith.addf %100, %105 : vector<64x128xf32>
    %cst_28 = arith.constant 5.000000e-01 : f32
    %107 = vector.broadcast %cst_28 : f32 to vector<64x128xf32>
    %108 = arith.mulf %107, %106 : vector<64x128xf32>
    %109 = math.tanh %108 : vector<64x128xf32>
    %cst_29 = arith.constant 1.000000e+00 : f32
    %110 = vector.broadcast %cst_29 : f32 to vector<64x128xf32>
    %111 = arith.addf %109, %110 : vector<64x128xf32>
    %cst_30 = arith.constant 5.000000e-01 : f32
    %112 = vector.broadcast %cst_30 : f32 to vector<64x128xf32>
    %113 = arith.mulf %112, %111 : vector<64x128xf32>
    %114 = arith.mulf %1, %113 : vector<64x128xf32>
    %c80 = arith.constant 80 : index
    %c0_31 = arith.constant 0 : index
    %115 = vector.load %arg5[%c80, %c0_31] : memref<160x64xf32, #tpu.memory_space<vmem>>, vector<80x64xf32>
    %cst_32 = arith.constant dense<0.000000e+00> : vector<80x128xf32>
    %116 = tpu.matmul %115, %114, %cst_32 {dimension_numbers = #tpu.dot_dimension_numbers<[1], [0], [0], [1], [0, 0, 1, 1], [], []>} : vector<80x64xf32>, vector<64x128xf32>, vector<80x128xf32> -> vector<80x128xf32>
    %117 = vector.extract_strided_slice %116 {offsets = [0, 0], sizes = [64, 128], strides = [1, 1]} : vector<80x128xf32> to vector<64x128xf32>
    %118 = vector.extract_strided_slice %5 {offsets = [0, 5], sizes = [64, 1], strides = [1, 1]} : vector<64x8xf32> to vector<64x1xf32>
    %119 = vector.broadcast %118 : vector<64x1xf32> to vector<64x128xf32>
    %120 = arith.addf %117, %119 : vector<64x128xf32>
    %cst_33 = arith.constant dense<0.000000e+00> : vector<128xf32>
    %121 = vector.multi_reduction <add>, %120, %cst_33 [0] : vector<64x128xf32> to vector<128xf32>
    %122 = vector.shape_cast %121 : vector<128xf32> to vector<1x128xf32>
    %cst_34 = arith.constant 6.400000e+01 : f32
    %123 = vector.broadcast %cst_34 : f32 to vector<1x128xf32>
    %124 = arith.divf %122, %123 : vector<1x128xf32>
    %125 = vector.broadcast %124 : vector<1x128xf32> to vector<64x128xf32>
    %126 = arith.subf %120, %125 : vector<64x128xf32>
    %127 = arith.mulf %126, %126 : vector<64x128xf32>
    %cst_35 = arith.constant dense<0.000000e+00> : vector<128xf32>
    %128 = vector.multi_reduction <add>, %127, %cst_35 [0] : vector<64x128xf32> to vector<128xf32>
    %129 = vector.shape_cast %128 : vector<128xf32> to vector<1x128xf32>
    %cst_36 = arith.constant 6.400000e+01 : f32
    %130 = vector.broadcast %cst_36 : f32 to vector<1x128xf32>
    %131 = arith.divf %129, %130 : vector<1x128xf32>
    %132 = vector.broadcast %124 : vector<1x128xf32> to vector<64x128xf32>
    %133 = arith.subf %120, %132 : vector<64x128xf32>
    %cst_37 = arith.constant 9.99999974E-6 : f32
    %134 = vector.broadcast %cst_37 : f32 to vector<1x128xf32>
    %135 = arith.addf %131, %134 : vector<1x128xf32>
    %136 = math.rsqrt %135 : vector<1x128xf32>
    %137 = vector.broadcast %136 : vector<1x128xf32> to vector<64x128xf32>
    %138 = arith.mulf %133, %137 : vector<64x128xf32>
    %139 = vector.extract_strided_slice %5 {offsets = [0, 6], sizes = [64, 1], strides = [1, 1]} : vector<64x8xf32> to vector<64x1xf32>
    %140 = vector.broadcast %139 : vector<64x1xf32> to vector<64x128xf32>
    %141 = arith.mulf %138, %140 : vector<64x128xf32>
    %142 = vector.extract_strided_slice %5 {offsets = [0, 7], sizes = [64, 1], strides = [1, 1]} : vector<64x8xf32> to vector<64x1xf32>
    %143 = vector.broadcast %142 : vector<64x1xf32> to vector<64x128xf32>
    %144 = arith.addf %141, %143 : vector<64x128xf32>
    %cst_38 = arith.constant 0.000000e+00 : f32
    %145 = vector.broadcast %cst_38 : f32 to vector<64x128xf32>
    %146 = arith.maximumf %144, %145 : vector<64x128xf32>
    %c16 = arith.constant 16 : index
    %c0_39 = arith.constant 0 : index
    %147 = vector.load %arg6[%c16, %c0_39] : memref<32x64xf32, #tpu.memory_space<vmem>>, vector<16x64xf32>
    %cst_40 = arith.constant dense<0.000000e+00> : vector<16x128xf32>
    %148 = tpu.matmul %147, %146, %cst_40 {dimension_numbers = #tpu.dot_dimension_numbers<[1], [0], [0], [1], [0, 0, 1, 1], [], []>} : vector<16x64xf32>, vector<64x128xf32>, vector<16x128xf32> -> vector<16x128xf32>
    %149 = vector.extract_strided_slice %116 {offsets = [64, 0], sizes = [4, 128], strides = [1, 1]} : vector<80x128xf32> to vector<4x128xf32>
    %150 = vector.extract_strided_slice %148 {offsets = [0, 0], sizes = [4, 128], strides = [1, 1]} : vector<16x128xf32> to vector<4x128xf32>
    %151 = arith.addf %149, %150 : vector<4x128xf32>
    %152 = vector.extract_strided_slice %6 {offsets = [3, 0], sizes = [4, 1], strides = [1, 1]} : vector<7x1xf32> to vector<4x1xf32>
    %153 = vector.broadcast %152 : vector<4x1xf32> to vector<4x128xf32>
    %154 = arith.addf %151, %153 : vector<4x128xf32>
    %155 = arith.mulf %72, %72 : vector<3x128xf32>
    %cst_41 = arith.constant dense<0.000000e+00> : vector<128xf32>
    %156 = vector.multi_reduction <add>, %155, %cst_41 [0] : vector<3x128xf32> to vector<128xf32>
    %157 = vector.shape_cast %156 : vector<128xf32> to vector<1x128xf32>
    %cst_42 = arith.constant 1.000000e-24 : f32
    %158 = vector.broadcast %cst_42 : f32 to vector<1x128xf32>
    %159 = arith.maximumf %157, %158 : vector<1x128xf32>
    %160 = math.rsqrt %159 : vector<1x128xf32>
    %161 = vector.extract_strided_slice %154 {offsets = [0, 0], sizes = [2, 128], strides = [1, 1]} : vector<4x128xf32> to vector<2x128xf32>
    %162 = arith.mulf %161, %161 : vector<2x128xf32>
    %cst_43 = arith.constant dense<0.000000e+00> : vector<128xf32>
    %163 = vector.multi_reduction <add>, %162, %cst_43 [0] : vector<2x128xf32> to vector<128xf32>
    %164 = vector.shape_cast %163 : vector<128xf32> to vector<1x128xf32>
    %cst_44 = arith.constant 1.000000e-24 : f32
    %165 = vector.broadcast %cst_44 : f32 to vector<1x128xf32>
    %166 = arith.maximumf %164, %165 : vector<1x128xf32>
    %167 = math.rsqrt %166 : vector<1x128xf32>
    %168 = vector.broadcast %160 : vector<1x128xf32> to vector<3x128xf32>
    %169 = arith.mulf %72, %168 : vector<3x128xf32>
    %c0_45 = arith.constant 0 : index
    %c0_46 = arith.constant 0 : index
    %c0_47 = arith.constant 0 : index
    %170 = vector.load %arg10[%c0_45, %c0_46, %c0_47] : memref<1x7x128xf32, #tpu.memory_space<vmem>>, vector<1x3x128xf32>
    %171 = vector.shape_cast %170 : vector<1x3x128xf32> to vector<3x128xf32>
    %172 = vector.shape_cast %169 : vector<3x128xf32> to vector<1x3x128xf32>
    tpu.vector_store %arg10[%c0_45, %c0_46, %c0_47], %172 {strides = array<i32>} : memref<1x7x128xf32, #tpu.memory_space<vmem>>, vector<1x3x128xf32>,
    %173 = vector.broadcast %167 : vector<1x128xf32> to vector<2x128xf32>
    %174 = arith.mulf %161, %173 : vector<2x128xf32>
    %c0_48 = arith.constant 0 : index
    %c3 = arith.constant 3 : index
    %c0_49 = arith.constant 0 : index
    %175 = vector.load %arg10[%c0_48, %c3, %c0_49] : memref<1x7x128xf32, #tpu.memory_space<vmem>>, vector<1x2x128xf32>
    %176 = vector.shape_cast %175 : vector<1x2x128xf32> to vector<2x128xf32>
    %177 = vector.shape_cast %174 : vector<2x128xf32> to vector<1x2x128xf32>
    tpu.vector_store %arg10[%c0_48, %c3, %c0_49], %177 {strides = array<i32>} : memref<1x7x128xf32, #tpu.memory_space<vmem>>, vector<1x2x128xf32>,
    %178 = vector.extract_strided_slice %154 {offsets = [2, 0], sizes = [2, 128], strides = [1, 1]} : vector<4x128xf32> to vector<2x128xf32>
    %cst_50 = arith.constant 5.000000e-01 : f32
    %179 = vector.broadcast %cst_50 : f32 to vector<2x128xf32>
    %180 = arith.mulf %179, %178 : vector<2x128xf32>
    %181 = math.tanh %180 : vector<2x128xf32>
    %cst_51 = arith.constant 1.000000e+00 : f32
    %182 = vector.broadcast %cst_51 : f32 to vector<2x128xf32>
    %183 = arith.addf %181, %182 : vector<2x128xf32>
    %cst_52 = arith.constant 5.000000e-01 : f32
    %184 = vector.broadcast %cst_52 : f32 to vector<2x128xf32>
    %185 = arith.mulf %184, %183 : vector<2x128xf32>
    %c0_53 = arith.constant 0 : index
    %c5 = arith.constant 5 : index
    %c0_54 = arith.constant 0 : index
    %186 = vector.load %arg10[%c0_53, %c5, %c0_54] : memref<1x7x128xf32, #tpu.memory_space<vmem>>, vector<1x2x128xf32>
    %187 = vector.shape_cast %186 : vector<1x2x128xf32> to vector<2x128xf32>
    %188 = vector.shape_cast %185 : vector<2x128xf32> to vector<1x2x128xf32>
    tpu.vector_store %arg10[%c0_53, %c5, %c0_54], %188 {strides = array<i32>} : memref<1x7x128xf32, #tpu.memory_space<vmem>>, vector<1x2x128xf32>,
    return
  }
  func.func @transform_0(%arg0: i32, %arg1: i32) -> (i32, i32, i32) {
    %c0_i32 = arith.constant 0 : i32
    %c0_i32_0 = arith.constant 0 : i32
    return %arg0, %c0_i32, %arg1 : i32, i32, i32
  }
  func.func @transform_1(%arg0: i32, %arg1: i32) -> (i32, i32, i32) {
    %c0_i32 = arith.constant 0 : i32
    %c0_i32_0 = arith.constant 0 : i32
    return %arg0, %c0_i32, %arg1 : i32, i32, i32
  }
  func.func @transform_2(%arg0: i32, %arg1: i32) -> (i32, i32) {
    %c0_i32 = arith.constant 0 : i32
    %c0_i32_0 = arith.constant 0 : i32
    %c0_i32_1 = arith.constant 0 : i32
    return %c0_i32, %c0_i32_0 : i32, i32
  }
  func.func @transform_3(%arg0: i32, %arg1: i32) -> (i32, i32) {
    %c0_i32 = arith.constant 0 : i32
    %c0_i32_0 = arith.constant 0 : i32
    %c0_i32_1 = arith.constant 0 : i32
    return %c0_i32, %c0_i32_0 : i32, i32
  }
  func.func @transform_4(%arg0: i32, %arg1: i32) -> (i32, i32) {
    %c0_i32 = arith.constant 0 : i32
    %c0_i32_0 = arith.constant 0 : i32
    %c0_i32_1 = arith.constant 0 : i32
    return %c0_i32, %c0_i32_0 : i32, i32
  }
  func.func @transform_5(%arg0: i32, %arg1: i32) -> (i32, i32) {
    %c0_i32 = arith.constant 0 : i32
    %c0_i32_0 = arith.constant 0 : i32
    %c0_i32_1 = arith.constant 0 : i32
    return %c0_i32, %c0_i32_0 : i32, i32
  }
  func.func @transform_6(%arg0: i32, %arg1: i32) -> (i32, i32) {
    %c0_i32 = arith.constant 0 : i32
    %c0_i32_0 = arith.constant 0 : i32
    %c0_i32_1 = arith.constant 0 : i32
    return %c0_i32, %c0_i32_0 : i32, i32
  }
  func.func @transform_7(%arg0: i32, %arg1: i32) -> (i32, i32) {
    %c0_i32 = arith.constant 0 : i32
    %c0_i32_0 = arith.constant 0 : i32
    %c0_i32_1 = arith.constant 0 : i32
    return %c0_i32, %c0_i32_0 : i32, i32
  }
  func.func @transform_8(%arg0: i32, %arg1: i32) -> (i32, i32, i32) {
    %c0_i32 = arith.constant 0 : i32
    %c0_i32_0 = arith.constant 0 : i32
    return %arg0, %c0_i32, %arg1 : i32, i32, i32
  }
}

</mosaic_0001>

<bundles_post_ra>
// kernel: tpu_custom_call.1
= control target key start
LH: loop header
LB: loop body
LE: loop exit
PB: predicated region body
PF: predicated region fallthrough
CT: control target
= control target key end

     0   :  { %s2824_s27 = smov 0   ;;  %s2826_s28 = smov 0   ;;  %s3692_s0 = inlined_call_operand.vmem [shape: f32[2,64,256], index: 0, kind: input, shape index: {}]   ;;  %s3693_s1 = inlined_call_operand.vmem [shape: f32[2,2,256], index: 1, kind: input, shape index: {}]   ;;  %s3694_s2 = inlined_call_operand.vmem [shape: f32[128,64], index: 2, kind: input, shape index: {}]   ;;  %s3695_s3 = inlined_call_operand.vmem [shape: f32[160,64], index: 3, kind: input, shape index: {}]   ;;  %s3696_s4 = inlined_call_operand.vmem [shape: f32[32,64], index: 4, kind: input, shape index: {}]   ;;  %s3697_s5 = inlined_call_operand.vmem [shape: f32[64,7], index: 5, kind: input, shape index: {}]   ;;  %s3698_s6 = inlined_call_operand.vmem [shape: f32[64,8], index: 6, kind: input, shape index: {}]   ;;  %s3699_s7 = inlined_call_operand.vmem [shape: f32[7,1], index: 7, kind: input, shape index: {}]   ;;  %s3700_s8 = inlined_call_operand.vmem [shape: f32[2,7,256], index: 8, kind: output, shape index: {}]  }
   0x1   :  { %s2828_s29 = smov 0   ;;  %s2830_s30 = smov 0  }
   0x2   :  { %s2832_s9 = smov 0   ;;  %s2834_s10 = smov 0  }
   0x3   :  { %s2836_s11 = smov 0  }
   0x4 LB: > { %s27_s12 = sadd.s32 1, %s2761_s9  ;;  %s30_s13 = sadd.s32 1, %s2765_s10  ;;  %s2769_s11 = sphi %s2836_s11, %s18_s11   ;;  %s2765_s10 = sphi %s2834_s10, %s3708_s10   ;;  %s2761_s9 = sphi %s2832_s9, %s3707_s9   ;;  %s2757_s30 = sphi %s2830_s30, %s3706_s30   ;;  %s2753_s29 = sphi %s2828_s29, %s3705_s29   ;;  %s2749_s28 = sphi %s2826_s28, %s3704_s28   ;;  %s2745_s27 = sphi %s2824_s27, %s3703_s27  }
   0x5   : > { %p28_p0 = scmp.ge.s32.totalorder %s27_s12, 2  ;;  %p46_p1 = scmp.ne.s32.totalorder %s2749_s28, %s2745_s27 }
   0x6   : > { %p47_p2 = scmp.eq.s32.totalorder %s2769_s11, 0  ;;  %s39_s17 = sadd.s32 1, %s2749_s28 }
   0x7   : > { %s3710_s12 = smov (%p28_p0, %s27_s12), 0  ;;  %s3712_s13 = smov (!%p28_p0, %s30_s13), %s2765_s10 }
   0x8   : > { %p48_p3 = por %p47_p2, %p46_p1  ;;  %p32_p4 = scmp.ge.s32.totalorder %s3712_s13, 2 }
   0x9   : > { %s35_s14 = ssub.s32 %s2761_s9, %s3710_s12  ;;  %p2179_p6 = scmp.ge.s32.totalorder %s2769_s11, 4 }
   0xa   : > { %s3714_s13 = smov (%p32_p4, %s3712_s13), 0 }
   0xb   : > { %s34_s15 = ssub.s32 %s2765_s10, %s3714_s13  ;;  %272 = sbr.rel (%p2179_p6) target bundleno = 28 (0x1c), region = 40 }
   0xc   : > { %s36_s16 = sor.u32 %s35_s14, %s34_s15 }
   0xd   : > { %p37_p5 = scmp.eq.s32.totalorder %s36_s16, 0 }
   0xf   : > { %s2875_s18 = scalar_select %p37_p5, %s2749_s28, %s39_s17  }
  0x12   : > { %275 = sbr.rel (!%p48_p3) target bundleno = 28 (0x1c), region = 44  ;;  %s277_s19 = sand.u32 (%p48_p3), 1, %s2749_s28  }
  0x13   : > { %s2181_s20 = sshll.u32 (%p48_p3), %s2765_s10, 4  ;;  %s2180_s21 = sshll.u32 (%p48_p3), %s277_s19, 6 }
  0x14   : > { %s281_s22 = sadd.s32 (%p48_p3), %s2761_s9, %s2181_s20  ;;  %s279_s14 = scalar_lea.vmem (%p48_p3), [#allocation2], %s2180_s21 }
  0x15   : > { %s2182_s23 = sshll.u32 (%p48_p3), %s281_s22, 3 }
  0x16   : > { %s283_s26 = scalar_lea.vmem (%p48_p3), %s3692_s0, %s2182_s23 }
  0x17   : > { %v325_v0 = vld [vmem:[%s283_s26] sm:$0xff] (%p48_p3)  ;;  %v327_v1 = vld [vmem:[%s283_s26 + $0x10] sm:$0xff] (%p48_p3) }
  0x18   : > { %v329_v2 = vld [vmem:[%s283_s26 + $0x20] sm:$0xff] (%p48_p3)  ;;  %326 = vst [vmem:[%s279_s14] sm:$0xff] (%p48_p3), %v325_v0  ;;  %328 = vst [vmem:[%s279_s14 + $0x8] sm:$0xff] (%p48_p3), %v327_v1  ;;  %v331_v3 = vld [vmem:[%s283_s26 + $0x30] sm:$0xff] (%p48_p3) }
  0x19   : > { %330 = vst [vmem:[%s279_s14 + $0x10] sm:$0xff] %v329_v2  ;;  %v333_v4 = vld [vmem:[%s283_s26 + $0x40] sm:$0xff]  ;;  %v335_v5 = vld [vmem:[%s283_s26 + $0x50] sm:$0xff]  ;;  %332 = vst [vmem:[%s279_s14 + $0x18] sm:$0xff] %v331_v3 }
  0x1a   : > { %334 = vst [vmem:[%s279_s14 + $0x20] sm:$0xff] %v333_v4  ;;  %336 = vst [vmem:[%s279_s14 + $0x28] sm:$0xff] %v335_v5  ;;  %v337_v6 = vld [vmem:[%s283_s26 + $0x60] sm:$0xff]  ;;  %v339_v7 = vld [vmem:[%s283_s26 + $0x70] sm:$0xff] }
  0x1b   : > { %338 = vst [vmem:[%s279_s14 + $0x30] sm:$0xff] %v337_v6  ;;  %340 = vst [vmem:[%s279_s14 + $0x38] sm:$0xff] %v339_v7 }
  0x1c PF: > { %p2183_p7 = scmp.ge.s32.totalorder %s2769_s11, 1  ;;  %p356_p8 = scmp.lt.s32.totalorder %s2769_s11, 5 }
  0x1e   : > { %p357_p9 = pnand %p2183_p7, %p356_p8 }
  0x1f   : > { %s363_s15 = sand.u32 (!%p357_p9), 1, %s2745_s27   ;;  %v449_v8 = vld [vmem:[%s3694_s2] sm:$0xff] (!%p357_p9)  ;;  %vm465_vm0 = vcmask (!%p357_p9), 523264   ;;  %v2771_v9 = vmov (!%p357_p9), 0   ;;  %v2926_v19 = vld [vmem:[%s3697_s5 + $0x8] sm:$0xff] (!%p357_p9)  ;;  %v2772_v25 = vmov (!%p357_p9), 1   ;;  %v747_v0 = vlaneseq (!%p357_p9) }
  0x20   : > { %360 = sbr.rel (%p357_p9) target bundleno = 1460 (0x5b4), region = 86  ;;  %s2184_s19 = sshll.u32 (!%p357_p9), %s363_s15, 6  ;;  %2327 = vmatprep.mubr.msk.f32.mxu0 (!%p357_p9), %vm465_vm0, %v449_v8  ;;  %2596 = vset.pattern.permute.xlu1 (!%p357_p9), %v2771_v9  ;;  %v2895_v10 = vld [vmem:[%s3697_s5] sm:$0xff] (!%p357_p9)  ;;  %v2946_v24 = vld [vmem:[%s3698_s6 + $0x8] sm:$0xff] (!%p357_p9)  ;;  %v2955_v27 = vld [vmem:[%s3698_s6 + $0x10] sm:$0xff] (!%p357_p9)  ;;  %v2773_v49 = vmov (!%p357_p9), 2  }
  0x21   : > { %2595 = vset.pattern.permute.xlu0 (!%p357_p9), %v2771_v9  ;;  %s2898_s22 = scalar_lea.vmem (!%p357_p9), [#allocation2], %s2184_s19  ;;  %709 = vperm.xlu1 (!%p357_p9), %2596, %v2895_v10   ;;  %v2931_v20 = vld [vmem:[%s3698_s6] sm:$0xff] (!%p357_p9)  ;;  %v2960_v28 = vld [vmem:[%s3698_s6 + $0x18] sm:$0xff] (!%p357_p9)  ;;  %v2968_v29 = vld [vmem:[%s3697_s5 + $0x10] sm:$0xff] (!%p357_p9)  ;;  %v2774_v50 = vmov (!%p357_p9), 3   ;;  %p407_p10 = scmp.lt.s32.totalorder (!%p357_p9), %s2757_s30, 1 }
  0x22   : > { %v2901_v11 = vld [vmem:[%s2898_s22] sm:$0xff] (!%p357_p9)  ;;  %v2904_v12 = vld [vmem:[%s2898_s22 + $0x8] sm:$0xff] (!%p357_p9)  ;;  %v2907_v13 = vld [vmem:[%s2898_s22 + $0x10] sm:$0xff] (!%p357_p9)  ;;  %661 = vperm.xlu0 (!%p357_p9), %2595, %v2931_v20   ;;  %p409_p11 = scmp.lt.s32.totalorder (!%p357_p9), %s2753_s29, 1  ;;  %v3134_v3 = vshrl.u32 (!%p357_p9), %v747_v0, 7  ;;  %vm2040_vm1 = vcmask (!%p357_p9), 1042432  }
  0x23   : > { %v2451_v14 = vpack.c.bf16 (!%p357_p9), %v2904_v12, %v2901_v11  ;;  %v2913_v15 = vld [vmem:[%s2898_s22 + $0x18] sm:$0xff] (!%p357_p9)  ;;  %v2918_v17 = vld [vmem:[%s2898_s22 + $0x20] sm:$0xff] (!%p357_p9)  ;;  %v2921_v18 = vld [vmem:[%s2898_s22 + $0x28] sm:$0xff] (!%p357_p9)  ;;  %vm2051_vm2 = vcmask (!%p357_p9), 1041408  }
  0x24   : > { %v2455_v16 = vpack.c.bf16 (!%p357_p9), %v2913_v15, %v2907_v13  ;;  %v2459_v21 = vpack.c.bf16 (!%p357_p9), %v2921_v18, %v2918_v17  ;;  %v2938_v22 = vld [vmem:[%s2898_s22 + $0x30] sm:$0xff] (!%p357_p9)  ;;  %v2941_v23 = vld [vmem:[%s2898_s22 + $0x38] sm:$0xff] (!%p357_p9)  ;;  %v2973_v30 = vld [vmem:[%s3698_s6 + $0x28] sm:$0xff] (!%p357_p9)  ;;  %v749_v5 = vsub.s32 (!%p357_p9), 0, %v3134_v3  ;;  %v3701_v8 = vsub.s32 (!%p357_p9), 1, %v3134_v3 }
  0x25   : > { %2452 = vmatprep.subr.bf16.mxu0 (!%p357_p9), %v2451_v14  ;;  %714 = vperm.xlu1 (!%p357_p9), %2596, %v2926_v19   ;;  %v2463_v26 = vpack.c.bf16 (!%p357_p9), %v2941_v23, %v2938_v22  ;;  %v450_v31 = vld [vmem:[%s3694_s2 + $0x8] sm:$0xff] (!%p357_p9)  ;;  %v451_v32 = vld [vmem:[%s3694_s2 + $0x10] sm:$0xff] (!%p357_p9)  ;;  %v2987_v33 = vld [vmem:[%s3697_s5 + $0x18] sm:$0xff] (!%p357_p9) }
  0x26   : > { %2454 = vmatpush3.bf16.msra.mxu0 (!%p357_p9), %v2451_v14  ;;  %666 = vperm.xlu0 (!%p357_p9), %2595, %v2946_v24   ;;  %v2992_v34 = vld [vmem:[%s3698_s6 + $0x38] sm:$0xff] (!%p357_p9)  ;;  %v453_v36 = vld [vmem:[%s3694_s2 + $0x20] sm:$0xff] (!%p357_p9)  ;;  %v454_v37 = vld [vmem:[%s3694_s2 + $0x28] sm:$0xff] (!%p357_p9) }
  0x27   : > { %2456 = vmatprep.subr.bf16.mxu0 %v2455_v16  ;;  %v452_v35 = vld [vmem:[%s3694_s2 + $0x18] sm:$0xff]  ;;  %v455_v38 = vld [vmem:[%s3694_s2 + $0x30] sm:$0xff]  ;;  %v3021_v40 = vld [vmem:[%s3698_s6 + $0x20] sm:$0xff]  ;;  %s3716_s30 = smov (!%p407_p10, %s2757_s30), 1  ;;  %s3718_s29 = smov (!%p409_p11, %s2753_s29), 1 }
  0x28   : > { %v456_v39 = vld [vmem:[%s3694_s2 + $0x38] sm:$0xff]  ;;  %v3030_v41 = vld [vmem:[%s3697_s5 + $0x20] sm:$0xff]  ;;  %v3037_v42 = vld [vmem:[%s3697_s5 + $0x28] sm:$0xff]  ;;  %s2185_s24 = sshll.u32 %s3716_s30, 1 }
  0x29   : > { %2597 = vset.pattern.permute.xlu1 %v2772_v25  ;;  %v3042_v43 = vld [vmem:[%s3697_s5 + $0x30] sm:$0xff]  ;;  %v3061_v45 = vld [vmem:[%s3697_s5 + $0x38] sm:$0xff]  ;;  %v859_v46 = vld [vmem:[%s3695_s3] sm:$0xff]  ;;  %s3131_s25 = sadd.s32 %s2185_s24, %s3718_s29 }
  0x2a   : > { %2458 = vmatpush3.bf16.msra.mxu0 %v2455_v16  ;;  %772 = vperm.xlu1 %2597, %v2926_v19   ;;  %v3051_v44 = vld [vmem:[%s3698_s6 + $0x30] sm:$0xff]  ;;  %v457_v48 = vld [vmem:[%s3694_s2 + $0x40] sm:$0xff]  ;;  %v458_v51 = vld [vmem:[%s3694_s2 + $0x48] sm:$0xff]  ;;  %s2186_s26 = sshll.u32 %s3131_s25, 1  ;;  %s2188_s17 = sshll.u32 %s3131_s25, 3 }
  0x2b   : > { %2460 = vmatprep.subr.bf16.mxu0 %v2459_v21  ;;  %676 = vperm.xlu0 %2595, %v2960_v28   ;;  %s414_s16 = scalar_lea.vmem %s3693_s1, %s2186_s26  ;;  %s3613_s21 = scalar_lea.vmem %s3700_s8, %s2188_s17 }
  0x2c   : > { %2367 = vmatprep.mubr.msk.f32.mxu1 %vm465_vm0, %v859_v46  ;;  %v431_v6 = vld [vmem:[%s414_s16] sm:$0x3] }
  0x2d   : > { %v3147_v16 = vrot.slane %v431_v6, %v3701_v8 }
  0x2e   : > { %2462 = vmatpush3.bf16.msra.mxu0 %v2459_v21  ;;  %2598 = vset.pattern.permute.xlu1 %v2771_v9 }
  0x2f   : > { %2464 = vmatprep.subr.bf16.mxu0 %v2463_v26  ;;  %671 = vperm.xlu1 %2598, %v2955_v27  }
  0x30   : > { %686 = vperm.xlu0 %2595, %v2973_v30  }
  0x32   : > { %2466 = vmatpush3.bf16.msra.mxu0 %v2463_v26 }
  0x33   : > { %719 = vperm.xlu1 %2598, %v2968_v29  }
  0x34   : > { %696 = vperm.xlu0 %2595, %v2992_v34  }
  0x35   : > { %2328 = vmatmul.mubr.msk.f32.vlgmr.msra.gmra.mrb[0].mxu0 %vm465_vm0, %v450_v31 }
  0x36   : > { %2330 = vmatprep.mubr.msk.f32.mxu0 %vm465_vm0, %v451_v32 }
  0x37   : > { %724 = vperm.xlu1 %2598, %v2987_v33  }
  0x38   : > { %2603 = vset.pattern.permute.xlu0 %v2772_v25 }
  0x39   : > { %2331 = vmatmul.mubr.msk.f32.gmra.mrb[2].mxu0 %vm465_vm0, %v452_v35  ;;  %768 = vperm.xlu0 %2603, %v2895_v10  }
  0x3a   : > { %2333 = vmatprep.mubr.msk.f32.mxu0 %vm465_vm0, %v453_v36 }
  0x3b   : > { %2599 = vset.pattern.permute.xlu1 %v2772_v25 }
  0x3c   : > { %780 = vperm.xlu1 %2599, %v2987_v33  }
  0x3d   : > { %2334 = vmatmul.mubr.msk.f32.gmra.mrb[4].mxu0 %vm465_vm0, %v454_v37  ;;  %776 = vperm.xlu0 %2603, %v2968_v29  }
  0x3e   : > { %2336 = vmatprep.mubr.msk.f32.mxu0 %vm465_vm0, %v455_v38 }
  0x40   : > { %2600 = vset.pattern.permute.xlu1 %v2771_v9 }
  0x41   : > { %2337 = vmatmul.mubr.msk.f32.gmra.mrb[6].mxu0 %vm465_vm0, %v456_v39  ;;  %681 = vperm.xlu1 %2600, %v3021_v40  }
  0x42   : > { %784 = vperm.xlu0 %2603, %v3030_v41   ;;  %2339 = vmatprep.mubr.msk.f32.mxu0 %vm465_vm0, %v457_v48 }
  0x45   : > { %729 = vperm.xlu1 %2600, %v3030_v41   ;;  %2340 = vmatmul.mubr.msk.f32.gmra.mrb[8].mxu0 %vm465_vm0, %v458_v51 }
  0x46   : > { %792 = vperm.xlu0 %2603, %v3042_v43  }
  0x49   : > { %734 = vperm.xlu1 %2600, %v3037_v42  }
  0x4a   : > { %1018 = vperm.xlu0 %2603, %v2946_v24  }
  0x4d   : > { %2601 = vset.pattern.permute.xlu1 %v2772_v25 }
  0x4e   : > { %788 = vperm.xlu1 %2601, %v3037_v42   ;;  %1026 = vperm.xlu0 %2603, %v2960_v28  }
  0x52   : > { %2602 = vset.pattern.permute.xlu1 %v2771_v9  ;;  %1034 = vperm.xlu0 %2603, %v2973_v30  }
  0x53   : > { %691 = vperm.xlu1 %2602, %v3051_v44  }
  0x56   : > { %1042 = vperm.xlu0 %2603, %v2992_v34  }
  0x57   : > { %739 = vperm.xlu1 %2602, %v3042_v43  }
  0x5a   : > { %2608 = vset.pattern.permute.xlu0 %v2774_v50 }
  0x5b   : > { %744 = vperm.xlu1 %2602, %v3061_v45   ;;  %1157 = vperm.xlu0 %2608, %v2955_v27  }
  0x5f   : > { %2604 = vset.pattern.permute.xlu1 %v2772_v25  ;;  %2609 = vset.pattern.permute.xlu0 %v2773_v49 }
  0x60   : > { %796 = vperm.xlu1 %2604, %v3061_v45   ;;  %1113 = vperm.xlu0 %2609, %v2946_v24  }
  0x64   : > { %1014 = vperm.xlu1 %2604, %v2931_v20   ;;  %1117 = vperm.xlu0 %2609, %v2955_v27  }
  0x68   : > { %1022 = vperm.xlu1 %2604, %v2955_v27   ;;  %1129 = vperm.xlu0 %2609, %v2973_v30  }
  0x6c   : > { %1030 = vperm.xlu1 %2604, %v3021_v40   ;;  %1133 = vperm.xlu0 %2609, %v3051_v44  }
  0x70   : > { %1038 = vperm.xlu1 %2604, %v3051_v44   ;;  %2614 = vset.pattern.permute.xlu0 %v2774_v50 }
  0x71   : > { %1173 = vperm.xlu0 %2614, %v3051_v44  }
  0x74   : > { %2605 = vset.pattern.permute.xlu1 %v2773_v49 }
  0x75   : > { %1109 = vperm.xlu1 %2605, %v2931_v20   ;;  %2619 = vset.pattern.permute.xlu0 %v2773_v49 }
  0x76   : > { %1330 = vperm.xlu0 %2619, %v2926_v19  }
  0x79   : > { %2606 = vset.pattern.permute.xlu1 %v2774_v50 }
  0x7a   : > { %1149 = vperm.xlu1 %2606, %v2931_v20   ;;  %1338 = vperm.xlu0 %2619, %v2987_v33  }
  0x7e   : > { %1153 = vperm.xlu1 %2606, %v2946_v24   ;;  %1342 = vperm.xlu0 %2619, %v3030_v41  }
  0x82   : > { %2607 = vset.pattern.permute.xlu1 %v2773_v49  ;;  %1350 = vperm.xlu0 %2619, %v3042_v43  }
  0x83   : > { %1121 = vperm.xlu1 %2607, %v2960_v28  }
  0x87   : > { %2610 = vset.pattern.permute.xlu1 %v2774_v50 }
  0x88   : > { %1161 = vperm.xlu1 %2610, %v2960_v28  }
  0x8c   : > { %2611 = vset.pattern.permute.xlu1 %v2773_v49 }
  0x8d   : > { %1125 = vperm.xlu1 %2611, %v3021_v40  }
  0x91   : > { %2612 = vset.pattern.permute.xlu1 %v2774_v50 }
  0x92   : > { %1165 = vperm.xlu1 %2612, %v3021_v40  }
  0x96   : > { %1169 = vperm.xlu1 %2612, %v2973_v30  }
  0x9a   : > { %2613 = vset.pattern.permute.xlu1 %v2773_v49 }
  0x9b   : > { %1137 = vperm.xlu1 %2613, %v2992_v34  }
  0x9f   : > { %2615 = vset.pattern.permute.xlu1 %v2774_v50 }
  0xa0   : > { %v3074_v47 = vpop.permute.xlu1 %709  ;;  %1177 = vperm.xlu1 %2615, %v2992_v34  }
  0xa1   : > { %v662_v58 = vpop.permute.xlu0 %661 }
  0xa4   : > { %v3088_v52 = vpop.permute.xlu1 %714  ;;  %2616 = vset.pattern.permute.xlu1 %v2771_v9  ;;  %v3143_v9 = vrot.slane %v431_v6, %v749_v5 }
  0xa5   : > { %v667_v60 = vpop.permute.xlu0 %666 }
  0xa6   : > { %v752_v26 = vmul.f32 %v3143_v9, %v3088_v52  ;;  %v751_v35 = vmul.f32 %v3143_v9, %v3074_v47 }
  0xa9   : > { %v3094_v53 = vpop.permute.xlu1 %772 }
  0xaa   : > { %v677_v62 = vpop.permute.xlu0 %676  ;;  %v804_v38 = vmul.f32 %v3147_v16, %v3094_v53 }
  0xae   : > { %v3101_v54 = vpop.permute.xlu1 %671 }
  0xaf   : > { %v687_v1 = vpop.permute.xlu0 %686 }
  0xb2   : > { %v3106_v55 = vpop.permute.xlu1 %719 }
  0xb3   : > { %v697_v4 = vpop.permute.xlu0 %696 }
  0xb6   : > { %v725_v56 = vpop.permute.xlu1 %724 }
  0xb7   : > { %v754_v0 = vmul.f32 %v3143_v9, %v725_v56 }
  0xb8   : > { %v769_v14 = vpop.permute.xlu0 %768 }
  0xb9   : > { %v803_v36 = vmul.f32 %v3147_v16, %v769_v14 }
  0xbb   : > { %v781_v57 = vpop.permute.xlu1 %780 }
  0xbc   : > { %v777_v39 = vpop.permute.xlu0 %776 }
  0xc0   : > { %v3121_v59 = vpop.permute.xlu1 %681 }
  0xc4   : > { %v730_v61 = vpop.permute.xlu1 %729 }
  0xc8   : > { %v735_v63 = vpop.permute.xlu1 %734 }
  0xc9   : > { %v756_v56 = vmul.f32 %v3143_v9, %v735_v63 }
  0xcd   : > { %v789_v2 = vpop.permute.xlu1 %788 }
  0xd2   : > { %v692_v7 = vpop.permute.xlu1 %691 }
  0xd6   : > { %v740_v21 = vpop.permute.xlu1 %739 }
 0x108   : > { %v2329_v25 = vpop.f32.mrb[0].mxu0 }
 0x109   : > { %v700_v31 = vadd.f32 %v2329_v25, %v667_v60  ;;  %v580_v32 = vpop.f32.mrb[1].mxu0  ;;  %v753_v60 = vmul.f32 %v3143_v9, %v3106_v55  ;;  %v745_v25 = vpop.permute.xlu1 %744 }
 0x10a   : > { %v699_v37 = vadd.f32 %v662_v58, %v580_v32  ;;  %v806_v58 = vmul.f32 %v3147_v16, %v781_v57 }
 0x10b   : > { %v760_v46 = vadd.f32 %v752_v26, %v700_v31  ;;  %v805_v26 = vmul.f32 %v3147_v16, %v777_v39 }
 0x10c   : > { %v759_v48 = vadd.f32 %v751_v35, %v699_v37  ;;  %v2332_v51 = vpop.f32.mrb[2].mxu0 }
 0x10d   : > { %v812_v6 = vadd.f32 %v804_v38, %v760_v46  ;;  %v702_v8 = vadd.f32 %v2332_v51, %v677_v62  ;;  %v590_v52 = vpop.f32.mrb[3].mxu0  ;;  %v785_v62 = vpop.permute.xlu0 %784 }
 0x10e   : > { %v811_v47 = vadd.f32 %v803_v36, %v759_v48  ;;  %v701_v14 = vadd.f32 %v3101_v54, %v590_v52  ;;  %v755_v36 = vmul.f32 %v3143_v9, %v730_v61  ;;  %v807_v51 = vmul.f32 %v3147_v16, %v785_v62  ;;  %v797_v63 = vpop.permute.xlu1 %796 }
 0x10f   : > { %v820_v32 = vmul.f32 0.5, %v812_v6  ;;  %v762_v53 = vadd.f32 %v754_v0, %v702_v8  ;;  %v808_v8 = vmul.f32 %v3147_v16, %v789_v2  ;;  %v758_v0 = vmul.f32 %v3143_v9, %v745_v25 }
 0x110   : > { %v819_v31 = vmul.f32 0.5, %v811_v47  ;;  %v761_v35 = vadd.f32 %v753_v60, %v701_v14  ;;  %v2335_v37 = vpop.f32.mrb[4].mxu0 }
 0x111   : > { %2657 = vtanh.f32 %v820_v32  ;;  %v814_v38 = vadd.f32 %v806_v58, %v762_v53  ;;  %v704_v46 = vadd.f32 %v2335_v37, %v687_v1  ;;  %v600_v55 = vpop.f32.mrb[5].mxu0  ;;  %v810_v1 = vmul.f32 %v3147_v16, %v797_v63  ;;  %v793_v32 = vpop.permute.xlu0 %792 }
 0x112   : > { %2659 = vtanh.f32 %v819_v31  ;;  %v813_v54 = vadd.f32 %v805_v26, %v761_v35  ;;  %v703_v57 = vadd.f32 %v3121_v59, %v600_v55  ;;  %v757_v59 = vmul.f32 %v3143_v9, %v740_v21 }
 0x113   : > { %v822_v48 = vmul.f32 0.5, %v814_v38  ;;  %v764_v39 = vadd.f32 %v756_v56, %v704_v46  ;;  %v809_v25 = vmul.f32 %v3147_v16, %v793_v32 }
 0x114   : > { %v821_v6 = vmul.f32 0.5, %v813_v54  ;;  %v763_v52 = vadd.f32 %v755_v36, %v703_v57  ;;  %v2338_v60 = vpop.f32.mrb[6].mxu0 }
 0x115   : > { %2661 = vtanh.f32 %v822_v48  ;;  %v816_v61 = vadd.f32 %v808_v8, %v764_v39  ;;  %v706_v47 = vadd.f32 %v2338_v60, %v697_v4  ;;  %v610_v14 = vpop.f32.mrb[7].mxu0 }
 0x116   : > { %2663 = vtanh.f32 %v821_v6  ;;  %v815_v2 = vadd.f32 %v807_v51, %v763_v52  ;;  %v705_v58 = vadd.f32 %v692_v7, %v610_v14 }
 0x117   : > { %v824_v53 = vmul.f32 0.5, %v816_v61  ;;  %v766_v26 = vadd.f32 %v758_v0, %v706_v47 }
 0x118   : > { %v823_v31 = vmul.f32 0.5, %v815_v2  ;;  %v765_v35 = vadd.f32 %v757_v59, %v705_v58 }
 0x119   : > { %2665 = vtanh.f32 %v824_v53  ;;  %v818_v37 = vadd.f32 %v810_v1, %v766_v26 }
 0x11a   : > { %2667 = vtanh.f32 %v823_v31  ;;  %v817_v56 = vadd.f32 %v809_v25, %v765_v35 }
 0x11b   : > { %v2658_v62 = vpop.eup %2657  ;;  %v826_v38 = vmul.f32 0.5, %v818_v37 }
 0x11c   : > { %v2660_v4 = vpop.eup %2659  ;;  %v825_v46 = vmul.f32 0.5, %v817_v56  ;;  %v836_v55 = vadd.f32 1.0, %v2658_v62  ;;  %v864_v62 = vld [vmem:[%s3695_s3 + $0x28] sm:$0xff] }
 0x11d   : > { %2669 = vtanh.f32 %v826_v38  ;;  %v835_v21 = vadd.f32 1.0, %v2660_v4  ;;  %v865_v38 = vld [vmem:[%s3695_s3 + $0x30] sm:$0xff]  ;;  %v866_v4 = vld [vmem:[%s3695_s3 + $0x38] sm:$0xff] }
 0x11e   : > { %2671 = vtanh.f32 %v825_v46  ;;  %v844_v7 = vmul.f32 0.5, %v836_v55  ;;  %v459_v46 = vld [vmem:[%s3694_s2 + $0x50] sm:$0xff]  ;;  %v460_v55 = vld [vmem:[%s3694_s2 + $0x58] sm:$0xff] }
 0x11f   : > { %v2662_v36 = vpop.eup %2661  ;;  %v843_v54 = vmul.f32 0.5, %v835_v21  ;;  %2342 = vmatprep.mubr.msk.f32.mxu0 %vm465_vm0, %v459_v46  ;;  %v461_v21 = vld [vmem:[%s3694_s2 + $0x60] sm:$0xff] }
 0x120   : > { %v2664_v57 = vpop.eup %2663  ;;  %v838_v8 = vadd.f32 1.0, %v2662_v36  ;;  %v852_v48 = vmul.f32 %v844_v7, %v2904_v12  ;;  %2343 = vmatmul.mubr.msk.f32.gmra.mrb[10].mxu0 %vm465_vm0, %v460_v55  ;;  %v462_v7 = vld [vmem:[%s3694_s2 + $0x68] sm:$0xff]  ;;  %v448_v36 = vld [vmem:[%s3699_s7] sm:$0x7f] }
 0x121   : > { %v837_v39 = vadd.f32 1.0, %v2664_v57  ;;  %v851_v51 = vmul.f32 %v843_v54, %v2901_v11  ;;  %2345 = vmatprep.mubr.msk.f32.mxu0 %vm465_vm0, %v461_v21  ;;  %1281 = vperm.xlu1 %2616, %v448_v36   ;;  %v2775_v54 = vmov 4   ;;  %v463_v57 = vld [vmem:[%s3694_s2 + $0x70] sm:$0xff] }
 0x122   : > { %v846_v0 = vmul.f32 0.5, %v838_v8  ;;  %2633 = vset.pattern.permute.xlu0 %v2775_v54  ;;  %v464_v8 = vld [vmem:[%s3694_s2 + $0x78] sm:$0xff] }
 0x123   : > { %v2666_v63 = vpop.eup %2665  ;;  %v2467_v6 = vpack.c.bf16 %v852_v48, %v851_v51  ;;  %v845_v52 = vmul.f32 0.5, %v837_v39  ;;  %1286 = vperm.xlu0 %2633, %v2931_v20   ;;  %v1015_v48 = vpop.permute.xlu1 %1014  ;;  %v2776_v39 = vmov 5  }
 0x124   : > { %v2668_v60 = vpop.eup %2667  ;;  %v840_v1 = vadd.f32 1.0, %v2666_v63  ;;  %v854_v61 = vmul.f32 %v846_v0, %v2913_v15  ;;  %2346 = vmatmul.mubr.msk.f32.gmra.mrb[12].mxu0 %vm465_vm0, %v462_v7  ;;  %v1019_v0 = vpop.permute.xlu0 %1018 }
 0x125   : > { %v839_v47 = vadd.f32 1.0, %v2668_v60  ;;  %2468 = vmatprep.subr.bf16.mxu1 %v2467_v6  ;;  %v853_v14 = vmul.f32 %v845_v52, %v2907_v13  ;;  %2617 = vset.pattern.permute.xlu1 %v2775_v54  ;;  %v867_v60 = vld [vmem:[%s3695_s3 + $0x40] sm:$0xff] }
 0x126   : > { %2470 = vmatpush3.bf16.msra.mxu1 %v2467_v6  ;;  %v848_v59 = vmul.f32 0.5, %v840_v1  ;;  %1290 = vperm.xlu1 %2617, %v2946_v24  }
 0x127   : > { %v2670_v2 = vpop.eup %2669  ;;  %v2471_v58 = vpack.c.bf16 %v854_v61, %v853_v14  ;;  %v847_v12 = vmul.f32 0.5, %v839_v47  ;;  %1294 = vperm.xlu0 %2633, %v2955_v27   ;;  %2348 = vmatprep.mubr.msk.f32.mxu0 %vm465_vm0, %v463_v57  ;;  %v1023_v51 = vpop.permute.xlu1 %1022  ;;  %v868_v61 = vld [vmem:[%s3695_s3 + $0x48] sm:$0xff]  ;;  %v1196_v14 = vld [vmem:[%s3696_s4] sm:$0xff] }
 0x128   : > { %v2672_v32 = vpop.eup %2671  ;;  %v842_v53 = vadd.f32 1.0, %v2670_v2  ;;  %v856_v11 = vmul.f32 %v848_v59, %v2921_v18  ;;  %v860_v18 = vld [vmem:[%s3695_s3 + $0x8] sm:$0xff]  ;;  %2349 = vmatmul.mubr.msk.f32.gmra.mrb[14].mxu0 %vm465_vm0, %v464_v8  ;;  %v1027_v6 = vpop.permute.xlu0 %1026 }
 0x129   : > { %v841_v26 = vadd.f32 1.0, %v2672_v32  ;;  %2472 = vmatprep.subr.bf16.mxu1 %v2471_v58  ;;  %v855_v25 = vmul.f32 %v847_v12, %v2918_v17  ;;  %v861_v17 = vld [vmem:[%s3695_s3 + $0x10] sm:$0xff]  ;;  %v3286_v2 = vpop.f32.mrb[8].mxu0 }
 0x12a   : > { %2474 = vmatpush3.bf16.msra.mxu1 %v2471_v58  ;;  %v850_v31 = vmul.f32 0.5, %v842_v53  ;;  %2618 = vset.pattern.permute.xlu1 %v2773_v49  ;;  %v2777_v58 = vmov 6   ;;  %v3290_v12 = vpop.f32.mrb[9].mxu0 }
 0x12b   : > { %v2475_v15 = vpack.c.bf16 %v856_v11, %v855_v25  ;;  %v849_v35 = vmul.f32 0.5, %v841_v26  ;;  %1326 = vperm.xlu1 %2618, %v2895_v10   ;;  %1434 = vperm.xlu0 %2633, %v2987_v33   ;;  %v3263_v63 = vpop.permute.xlu1 %1030 }
 0x12c   : > { %v858_v37 = vmul.f32 %v850_v31, %v2941_v23  ;;  %v863_v23 = vld [vmem:[%s3695_s3 + $0x20] sm:$0xff]  ;;  %v1035_v1 = vpop.permute.xlu0 %1034 }
 0x12d   : > { %2476 = vmatprep.subr.bf16.mxu1 %v2475_v15  ;;  %v857_v13 = vmul.f32 %v849_v35, %v2938_v22  ;;  %v862_v22 = vld [vmem:[%s3695_s3 + $0x18] sm:$0xff] }
 0x12e   : > { %2478 = vmatpush3.bf16.msra.mxu1 %v2475_v15 }
 0x12f   : > { %v2479_v56 = vpack.c.bf16 %v858_v37, %v857_v13  ;;  %2620 = vset.pattern.permute.xlu1 %v2774_v50  ;;  %1442 = vperm.xlu0 %2633, %v3037_v42   ;;  %v3268_v52 = vpop.permute.xlu1 %1038 }
 0x130   : > { %1374 = vperm.xlu1 %2620, %v2895_v10   ;;  %v1043_v59 = vpop.permute.xlu0 %1042 }
 0x131   : > { %2480 = vmatprep.subr.bf16.mxu1 %v2479_v56 }
 0x132   : > { %2482 = vmatpush3.bf16.msra.mxu1 %v2479_v56 }
 0x133   : > { %2636 = vset.pattern.permute.xlu0 %v2774_v50  ;;  %v3279_v47 = vpop.permute.xlu1 %1109 }
 0x134   : > { %1378 = vperm.xlu1 %2620, %v2926_v19   ;;  %1382 = vperm.xlu0 %2636, %v2968_v29   ;;  %v3296_v53 = vpop.permute.xlu0 %1157 }
 0x135   : > { %2368 = vmatmul.mubr.msk.f32.vlgmr.msra.gmra.mrb[0].mxu1 %vm465_vm0, %v860_v18 }
 0x136   : > { %2370 = vmatprep.mubr.msk.f32.mxu1 %vm465_vm0, %v861_v17 }
 0x137   : > { %v3294_v32 = vpop.permute.xlu1 %1149 }
 0x138   : > { %2621 = vset.pattern.permute.xlu1 %v2775_v54  ;;  %1390 = vperm.xlu0 %2636, %v3030_v41   ;;  %v3303_v26 = vpop.permute.xlu0 %1113 }
 0x139   : > { %2371 = vmatmul.mubr.msk.f32.gmra.mrb[2].mxu1 %vm465_vm0, %v862_v22  ;;  %1298 = vperm.xlu1 %2621, %v2960_v28  }
 0x13a   : > { %2373 = vmatprep.mubr.msk.f32.mxu1 %vm465_vm0, %v863_v23 }
 0x13b   : > { %v3301_v11 = vpop.permute.xlu1 %1153 }
 0x13c   : > { %1398 = vperm.xlu0 %2636, %v3042_v43   ;;  %v3312_v25 = vpop.permute.xlu0 %1117 }
 0x13d   : > { %2374 = vmatmul.mubr.msk.f32.gmra.mrb[4].mxu1 %vm465_vm0, %v864_v62  ;;  %2622 = vset.pattern.permute.xlu1 %v2773_v49 }
 0x13e   : > { %2376 = vmatprep.mubr.msk.f32.mxu1 %vm465_vm0, %v865_v38  ;;  %1334 = vperm.xlu1 %2622, %v2968_v29  }
 0x140   : > { %2641 = vset.pattern.permute.xlu0 %v2777_v58  ;;  %v3320_v15 = vpop.permute.xlu0 %1129 }
 0x141   : > { %2377 = vmatmul.mubr.msk.f32.gmra.mrb[6].mxu1 %vm465_vm0, %v866_v4  ;;  %1542 = vperm.xlu0 %2641, %v3030_v41  }
 0x142   : > { %2623 = vset.pattern.permute.xlu1 %v2775_v54  ;;  %2379 = vmatprep.mubr.msk.f32.mxu1 %vm465_vm0, %v867_v60 }
 0x143   : > { %1422 = vperm.xlu1 %2623, %v2895_v10  }
 0x144   : > { %v3327_v62 = vpop.permute.xlu0 %1133 }
 0x145   : > { %2380 = vmatmul.mubr.msk.f32.gmra.mrb[8].mxu1 %vm465_vm0, %v868_v61  ;;  %2642 = vset.pattern.permute.xlu0 %v2776_v39 }
 0x146   : > { %2398 = vmatprep.mubr.msk.f32.mxu1 %vm465_vm0, %v1196_v14  ;;  %1478 = vperm.xlu0 %2642, %v2926_v19  }
 0x147   : > { %1426 = vperm.xlu1 %2623, %v2926_v19  }
 0x14a   : > { %1486 = vperm.xlu0 %2642, %v2987_v33  }
 0x14b   : > { %2624 = vset.pattern.permute.xlu1 %v2774_v50 }
 0x14c   : > { %1386 = vperm.xlu1 %2624, %v2987_v33  }
 0x14e   : > { %1494 = vperm.xlu0 %2642, %v3037_v42  }
 0x150   : > { %2625 = vset.pattern.permute.xlu1 %v2776_v39 }
 0x151   : > { %1474 = vperm.xlu1 %2625, %v2895_v10  }
 0x152   : > { %1502 = vperm.xlu0 %2642, %v3061_v45  }
 0x155   : > { %2626 = vset.pattern.permute.xlu1 %v2775_v54 }
 0x156   : > { %1302 = vperm.xlu1 %2626, %v3021_v40   ;;  %1772 = vperm.xlu0 %2642, %v2931_v20  }
 0x15a   : > { %1306 = vperm.xlu1 %2626, %v2973_v30   ;;  %1780 = vperm.xlu0 %2642, %v2955_v27  }
 0x15e   : > { %2627 = vset.pattern.permute.xlu1 %v2773_v49  ;;  %1788 = vperm.xlu0 %2642, %v3021_v40  }
 0x15f   : > { %1346 = vperm.xlu1 %2627, %v3037_v42  }
 0x162   : > { %1796 = vperm.xlu0 %2642, %v3051_v44  }
 0x163   : > { %2628 = vset.pattern.permute.xlu1 %v2775_v54 }
 0x164   : > { %1430 = vperm.xlu1 %2628, %v2968_v29  }
 0x166   : > { %2647 = vset.pattern.permute.xlu0 %v2777_v58 }
 0x167   : > { %1866 = vperm.xlu0 %2647, %v2931_v20  }
 0x168   : > { %2629 = vset.pattern.permute.xlu1 %v2777_v58 }
 0x169   : > { %1526 = vperm.xlu1 %2629, %v2895_v10   ;;  %v3308_v10 = vpop.permute.xlu1 %1121 }
 0x16b   : > { %1882 = vperm.xlu0 %2647, %v3021_v40  }
 0x16d   : > { %1530 = vperm.xlu1 %2629, %v2926_v19   ;;  %v3317_v19 = vpop.permute.xlu1 %1161 }
 0x171   : > { %2630 = vset.pattern.permute.xlu1 %v2774_v50  ;;  %v3324_v22 = vpop.permute.xlu1 %1125 }
 0x172   : > { %1394 = vperm.xlu1 %2630, %v3037_v42  }
 0x175   : > { %v3333_v36 = vpop.permute.xlu1 %1165 }
 0x176   : > { %2631 = vset.pattern.permute.xlu1 %v2776_v39 }
 0x177   : > { %1482 = vperm.xlu1 %2631, %v2968_v29  }
 0x179   : > { %v3343_v61 = vpop.permute.xlu1 %1169 }
 0x17b   : > { %2632 = vset.pattern.permute.xlu1 %v2775_v54 }
 0x17c   : > { %1310 = vperm.xlu1 %2632, %v3051_v44  }
 0x180   : > { %1314 = vperm.xlu1 %2632, %v2992_v34  }
 0x184   : > { %2634 = vset.pattern.permute.xlu1 %v2773_v49 }
 0x185   : > { %1354 = vperm.xlu1 %2634, %v3061_v45  }
 0x189   : > { %2635 = vset.pattern.permute.xlu1 %v2775_v54 }
 0x18a   : > { %1438 = vperm.xlu1 %2635, %v3030_v41  }
 0x18e   : > { %2637 = vset.pattern.permute.xlu1 %v2777_v58 }
 0x18f   : > { %1534 = vperm.xlu1 %2637, %v2968_v29  }
 0x193   : > { %1538 = vperm.xlu1 %2637, %v2987_v33  }
 0x197   : > { %2638 = vset.pattern.permute.xlu1 %v2774_v50 }
 0x198   : > { %1402 = vperm.xlu1 %2638, %v3061_v45  }
 0x19c   : > { %2639 = vset.pattern.permute.xlu1 %v2776_v39 }
 0x19d   : > { %1490 = vperm.xlu1 %2639, %v3030_v41  }
 0x1a1   : > { %2640 = vset.pattern.permute.xlu1 %v2775_v54 }
 0x1a2   : > { %1446 = vperm.xlu1 %2640, %v3042_v43  }
 0x1a6   : > { %1450 = vperm.xlu1 %2640, %v3061_v45  }
 0x1aa   : > { %2643 = vset.pattern.permute.xlu1 %v2777_v58 }
 0x1ab   : > { %1546 = vperm.xlu1 %2643, %v3037_v42  }
 0x1af   : > { %2644 = vset.pattern.permute.xlu1 %v2776_v39 }
 0x1b0   : > { %1498 = vperm.xlu1 %2644, %v3042_v43  }
 0x1b4   : > { %2645 = vset.pattern.permute.xlu1 %v2777_v58 }
 0x1b5   : > { %1550 = vperm.xlu1 %2645, %v3042_v43  }
 0x1b9   : > { %1554 = vperm.xlu1 %2645, %v3061_v45  }
 0x1bd   : > { %2646 = vset.pattern.permute.xlu1 %v2776_v39 }
 0x1be   : > { %1776 = vperm.xlu1 %2646, %v2946_v24  }
 0x1c2   : > { %1784 = vperm.xlu1 %2646, %v2960_v28  }
 0x1c6   : > { %1792 = vperm.xlu1 %2646, %v2973_v30  }
 0x1ca   : > { %1800 = vperm.xlu1 %2646, %v2992_v34  }
 0x1ce   : > { %2648 = vset.pattern.permute.xlu1 %v2777_v58 }
 0x1cf   : > { %1870 = vperm.xlu1 %2648, %v2946_v24  }
 0x208   : > { %v2369_v31 = vpop.f32.mrb[0].mxu1 }
 0x209   : > { %v1046_v35 = vadd.f32 %v2369_v31, %v1019_v0  ;;  %v965_v37 = vpop.f32.mrb[1].mxu1 }
 0x20a   : > { %v1045_v13 = vadd.f32 %v1015_v48, %v965_v37  ;;  %v3335_v48 = vpop.permute.xlu0 %1173 }
 0x20c   : > { %v1053_v56 = vadd.f32 %v1046_v35, %v1045_v13  ;;  %v2372_v18 = vpop.f32.mrb[2].mxu1 }
 0x20d   : > { %v975_v17 = vpop.f32.mrb[3].mxu1  ;;  %v1048_v38 = vadd.f32 %v2372_v18, %v1027_v6 }
 0x20e   : > { %v1047_v23 = vadd.f32 %v1023_v51, %v975_v17  ;;  %v1331_v60 = vpop.permute.xlu0 %1330 }
 0x210   : > { %v1054_v4 = vadd.f32 %v1053_v56, %v1047_v23  ;;  %v2375_v46 = vpop.f32.mrb[4].mxu1 }
 0x211   : > { %v985_v55 = vpop.f32.mrb[5].mxu1  ;;  %v1050_v57 = vadd.f32 %v2375_v46, %v1035_v1 }
 0x212   : > { %v1049_v21 = vadd.f32 %v3263_v63, %v985_v55  ;;  %v1055_v7 = vadd.f32 %v1054_v4, %v1048_v38  ;;  %v3348_v44 = vpop.permute.xlu0 %1338 }
 0x214   : > { %v1056_v27 = vadd.f32 %v1055_v7, %v1049_v21  ;;  %v2378_v8 = vpop.f32.mrb[6].mxu1 }
 0x215   : > { %v995_v49 = vpop.f32.mrb[7].mxu1  ;;  %v1052_v6 = vadd.f32 %v2378_v8, %v1043_v59  ;;  %v3351_v59 = vpop.permute.xlu1 %1137 }
 0x216   : > { %v1051_v51 = vadd.f32 %v3268_v52, %v995_v49  ;;  %v1057_v0 = vadd.f32 %v1056_v27, %v1050_v57  ;;  %v3355_v29 = vpop.permute.xlu0 %1342 }
 0x218   : > { %v1058_v63 = vadd.f32 %v1057_v0, %v1051_v51 }
 0x219   : > { %v3357_v18 = vpop.permute.xlu1 %1177 }
 0x21a   : > { %v1059_v1 = vadd.f32 %v1058_v63, %v1052_v6  ;;  %v3371_v55 = vpop.permute.xlu0 %1350 }
 0x21c   : > { %v1060_v14 = vrot.slane %v1059_v1, 4 }
 0x21d   : > { %v3369_v46 = vpop.permute.xlu1 %1281 }
 0x21e   : > { %v1061_v31 = vadd.f32 %v1060_v14, %v1059_v1 }
 0x220   : > { %v1062_v52 = vrot.slane %v1061_v31, 2 }
 0x222   : > { %v1063_v37 = vadd.f32 %v1062_v52, %v1061_v31 }
 0x224   : > { %v1064_v56 = vrot.slane %v1063_v37, 1 }
 0x226   : > { %v1065_v20 = vadd.f32 %v1064_v56, %v1063_v37 }
 0x228   : > { %v1067_v33 = vmul.f32 0.015625, %v1065_v20  ;;  %v1358_v20 = vmul.f32 %v1331_v60, %v3143_v9 }
 0x22a   : > { %v3361_v40 = vsub.f32 %v1046_v35, %v1067_v33  ;;  %v3363_v17 = vsub.f32 %v1047_v23, %v1067_v33  ;;  %v3365_v4 = vsub.f32 %v1050_v57, %v1067_v33  ;;  %v3367_v50 = vsub.f32 %v1051_v51, %v1067_v33  ;;  %v1287_v51 = vpop.permute.xlu0 %1286 }
 0x22b   : > { %v3373_v7 = vsub.f32 %v1052_v6, %v1067_v33  ;;  %v3375_v27 = vsub.f32 %v1045_v13, %v1067_v33  ;;  %v3377_v8 = vsub.f32 %v1048_v38, %v1067_v33  ;;  %v3379_v49 = vsub.f32 %v1049_v21, %v1067_v33  ;;  %v1291_v13 = vpop.permute.xlu1 %1290 }
 0x22c   : > { %v1077_v41 = vmul.f32 %v3361_v40, %v3361_v40  ;;  %v1078_v23 = vmul.f32 %v3363_v17, %v3363_v17  ;;  %v1318_v38 = vadd.f32 %v3286_v2, %v1291_v13  ;;  %v1317_v63 = vadd.f32 %v1287_v51, %v3290_v12 }
 0x22d   : > { %v1076_v35 = vmul.f32 %v3375_v27, %v3375_v27  ;;  %v1079_v21 = vmul.f32 %v3377_v8, %v3377_v8  ;;  %v1080_v54 = vmul.f32 %v3379_v49, %v3379_v49  ;;  %v1081_v14 = vmul.f32 %v3365_v4, %v3365_v4 }
 0x22e   : > { %v1082_v52 = vmul.f32 %v3367_v50, %v3367_v50  ;;  %v1083_v12 = vmul.f32 %v3373_v7, %v3373_v7  ;;  %v1366_v42 = vadd.f32 %v1358_v20, %v1318_v38 }
 0x22f   : > { %v1084_v57 = vadd.f32 %v1077_v41, %v1076_v35  ;;  %v1327_v1 = vpop.permute.xlu1 %1326 }
 0x230   : > { %v1357_v2 = vmul.f32 %v1327_v1, %v3143_v9 }
 0x231   : > { %v1085_v0 = vadd.f32 %v1084_v57, %v1078_v23 }
 0x232   : > { %v1365_v56 = vadd.f32 %v1357_v2, %v1317_v63 }
 0x233   : > { %v1086_v6 = vadd.f32 %v1085_v0, %v1079_v21  ;;  %v1375_v41 = vpop.permute.xlu1 %1374 }
 0x234   : > { %v1405_v35 = vmul.f32 %v1375_v41, %v3147_v16  ;;  %v2344_v41 = vpop.f32.mrb[10].mxu0 }
 0x235   : > { %v1087_v31 = vadd.f32 %v1086_v6, %v1080_v54 }
 0x236   : > { %v3409_v57 = vadd.f32 %v1405_v35, %v1365_v56 }
 0x237   : > { %v1088_v37 = vadd.f32 %v1087_v31, %v1081_v14  ;;  %v1379_v51 = vpop.permute.xlu1 %1378 }
 0x238   : > { %v1406_v21 = vmul.f32 %v1379_v51, %v3147_v16 }
 0x239   : > { %v1089_v33 = vadd.f32 %v1088_v37, %v1082_v52  ;;  %v1360_v52 = vmul.f32 %v3348_v44, %v3143_v9 }
 0x23a   : > { %v3414_v0 = vadd.f32 %v1406_v21, %v1366_v42 }
 0x23b   : > { %v1090_v23 = vadd.f32 %v1089_v33, %v1083_v12  ;;  %v1299_v1 = vpop.permute.xlu1 %1298 }
 0x23d   : > { %v1091_v13 = vrot.slane %v1090_v23, 4 }
 0x23f   : > { %v1092_v60 = vadd.f32 %v1091_v13, %v1090_v23  ;;  %v1335_v2 = vpop.permute.xlu1 %1334 }
 0x240   : > { %v1359_v39 = vmul.f32 %v1335_v2, %v3143_v9 }
 0x241   : > { %v1093_v54 = vrot.slane %v1092_v60, 2 }
 0x243   : > { %v1094_v6 = vadd.f32 %v1093_v54, %v1092_v60  ;;  %v3421_v43 = vpop.permute.xlu1 %1422  ;;  %v1295_v60 = vpop.permute.xlu0 %1294 }
 0x245   : > { %v1095_v63 = vrot.slane %v1094_v6, 1 }
 0x247   : > { %v1096_v38 = vadd.f32 %v1095_v63, %v1094_v6  ;;  %v3431_v12 = vpop.permute.xlu1 %1426 }
 0x249   : > { %v1097_v14 = vmul.f32 0.015625, %v1096_v38 }
 0x24b   : > { %v1098_v31 = vadd.f32 1e-05, %v1097_v14 }
 0x24d   : > { %2673 = vrsqrt.f32 %v1098_v31 }
 0x257   : > { %v2674_v45 = vpop.eup %2673 }
 0x258   : > { %v1100_v37 = vmul.f32 %v2674_v45, %v3375_v27  ;;  %v1103_v56 = vmul.f32 %v2674_v45, %v3377_v8  ;;  %v1101_v20 = vmul.f32 %v2674_v45, %v3361_v40  ;;  %v1104_v28 = vmul.f32 %v2674_v45, %v3379_v49 }
 0x259   : > { %v1102_v30 = vmul.f32 %v2674_v45, %v3363_v17  ;;  %v1105_v34 = vmul.f32 %v2674_v45, %v3365_v4  ;;  %v1106_v33 = vmul.f32 %v2674_v45, %v3367_v50  ;;  %v1107_v44 = vmul.f32 %v2674_v45, %v3373_v7 }
 0x25a   : > { %v1140_v27 = vmul.f32 %v3279_v47, %v1100_v37  ;;  %v1143_v8 = vmul.f32 %v3308_v10, %v1103_v56  ;;  %v1141_v40 = vmul.f32 %v3303_v26, %v1101_v20  ;;  %v1144_v49 = vmul.f32 %v3324_v22, %v1104_v28  ;;  %v630_v22 = vpop.f32.mrb[11].mxu0 }
 0x25b   : > { %v1142_v17 = vmul.f32 %v3312_v25, %v1102_v30  ;;  %v1145_v4 = vmul.f32 %v3320_v15, %v1105_v34  ;;  %v1146_v50 = vmul.f32 %v3327_v62, %v1106_v33  ;;  %v1147_v7 = vmul.f32 %v3351_v59, %v1107_v44  ;;  %v2347_v37 = vpop.f32.mrb[12].mxu0  ;;  %v2381_v44 = vpop.f32.mrb[8].mxu1 }
 0x25c   : > { %v1180_v35 = vadd.f32 %v3294_v32, %v1140_v27  ;;  %v1183_v47 = vadd.f32 %v3317_v19, %v1143_v8  ;;  %v1181_v10 = vadd.f32 %v3301_v11, %v1141_v40  ;;  %v1184_v26 = vadd.f32 %v3333_v36, %v1144_v49  ;;  %v1387_v32 = vpop.permute.xlu1 %1386  ;;  %v640_v20 = vpop.f32.mrb[13].mxu0 }
 0x25d   : > { %v1182_v24 = vadd.f32 %v3296_v53, %v1142_v17  ;;  %v1185_v25 = vadd.f32 %v3343_v61, %v1145_v4  ;;  %v1186_v15 = vadd.f32 %v3335_v48, %v1146_v50  ;;  %v1187_v62 = vadd.f32 %v3357_v18, %v1147_v7  ;;  %v3471_v34 = vpop.f32.mrb[14].mxu0  ;;  %v3475_v27 = vpop.f32.mrb[9].mxu1  ;;  %v1617_v50 = vld [vmem:[%s3695_s3 + $0x50] sm:$0xff] }
 0x25e   : > { %v1188_v23 = vmax.f32 %v1180_v35, 0.0  ;;  %v1191_v59 = vmax.f32 %v1183_v47, 0.0  ;;  %v1189_v42 = vmax.f32 %v1181_v10, 0.0  ;;  %v1192_v13 = vmax.f32 %v1184_v26, 0.0  ;;  %v3473_v33 = vpop.f32.mrb[15].mxu0  ;;  %2417 = vmatprep.mubr.msk.f32.mxu0 %vm465_vm0, %v1617_v50  ;;  %v2699_v10 = vld [vmem:[%s3698_s6] sm:$0xff] }
 0x25f   : > { %v1190_v51 = vmax.f32 %v1182_v24, 0.0  ;;  %v1193_v19 = vmax.f32 %v1185_v25, 0.0  ;;  %v1194_v21 = vmax.f32 %v1186_v15, 0.0  ;;  %v1195_v11 = vmax.f32 %v1187_v62, 0.0  ;;  %v2700_v26 = vld [vmem:[%s3698_s6 + $0x8] sm:$0xff]  ;;  %v2701_v24 = vld [vmem:[%s3698_s6 + $0x10] sm:$0xff] }
 0x260   : > { %v2483_v36 = vpack.c.bf16 %v1189_v42, %v1188_v23  ;;  %v1408_v54 = vmul.f32 %v1387_v32, %v3147_v16  ;;  %v1320_v53 = vadd.f32 %v2344_v41, %v1299_v1  ;;  %v1319_v6 = vadd.f32 %v1295_v60, %v630_v22  ;;  %v3460_v31 = vpop.permute.xlu1 %1474  ;;  %v1197_v1 = vld [vmem:[%s3696_s4 + $0x8] sm:$0xff]  ;;  %v2703_v15 = vld [vmem:[%s3698_s6 + $0x18] sm:$0xff]  ;;  %v2704_v23 = vld [vmem:[%s3698_s6 + $0x30] sm:$0xff] }
 0x261   : > { %v2495_v61 = vpack.c.bf16 %v1195_v11, %v1194_v21  ;;  %v2487_v63 = vpack.c.bf16 %v1191_v59, %v1190_v51  ;;  %v2491_v48 = vpack.c.bf16 %v1193_v19, %v1192_v13  ;;  %v2778_v47 = vmov 7   ;;  %v2702_v25 = vld [vmem:[%s3698_s6 + $0x28] sm:$0xff]  ;;  %v3514_v59 = vpop.permute.xlu0 %1434  ;;  %v2705_v51 = vld [vmem:[%s3698_s6 + $0x20] sm:$0xff] }
 0x262   : > { %2484 = vmatprep.subr.bf16.mxu1 %v2483_v36  ;;  %v1368_v18 = vadd.f32 %v1360_v52, %v1320_v53  ;;  %v3456_v38 = vadd.f32 %v1359_v39, %v1319_v6  ;;  %2649 = vset.pattern.permute.xlu1 %v2778_v47 }
 0x263   : > { %2486 = vmatpush3.bf16.msra.mxu1 %v2483_v36  ;;  %2652 = vset.pattern.permute.xlu0 %v2778_v47  ;;  %v2706_v36 = vld [vmem:[%s3698_s6 + $0x38] sm:$0xff] }
 0x264   : > { %2488 = vmatprep.subr.bf16.mxu1 %v2487_v63  ;;  %v3458_v14 = vadd.f32 %v1408_v54, %v1368_v18  ;;  %v1303_v2 = vpop.permute.xlu1 %1302  ;;  %1906 = vperm.xlu1 %2649, %v2699_v10  }
 0x265   : > { %v3467_v28 = vadd.f32 %v1303_v2, %v640_v20  ;;  %1910 = vperm.xlu0 %2652, %v2700_v26   ;;  %v3519_v13 = vpop.permute.xlu0 %1442  ;;  %v1363_v2 = vmul.f32 %v3371_v55, %v3143_v9  ;;  %v1559_v55 = vsub.s32 2, %v3134_v3 }
 0x267   : > { %2490 = vmatpush3.bf16.msra.mxu1 %v2487_v63 }
 0x268   : > { %2492 = vmatprep.subr.bf16.mxu1 %v2491_v48  ;;  %v1307_v45 = vpop.permute.xlu1 %1306  ;;  %2650 = vset.pattern.permute.xlu1 %v2777_v58 }
 0x269   : > { %v1322_v56 = vadd.f32 %v2347_v37, %v1307_v45  ;;  %1914 = vperm.xlu0 %2652, %v2701_v24   ;;  %1874 = vperm.xlu1 %2650, %v2701_v24   ;;  %v1383_v21 = vpop.permute.xlu0 %1382 }
 0x26b   : > { %2494 = vmatpush3.bf16.msra.mxu1 %v2491_v48 }
 0x26c   : > { %2496 = vmatprep.subr.bf16.mxu1 %v2495_v61  ;;  %v1347_v52 = vpop.permute.xlu1 %1346 }
 0x26d   : > { %v1362_v39 = vmul.f32 %v1347_v52, %v3143_v9  ;;  %1926 = vperm.xlu0 %2652, %v2702_v25   ;;  %1878 = vperm.xlu1 %2650, %v2703_v15   ;;  %v1391_v11 = vpop.permute.xlu0 %1390 }
 0x26e   : > { %v1409_v44 = vmul.f32 %v1391_v11, %v3147_v16 }
 0x26f   : > { %2498 = vmatpush3.bf16.msra.mxu1 %v2495_v61  ;;  %v3469_v30 = vadd.f32 %v1362_v39, %v1322_v56  ;;  %v1407_v56 = vmul.f32 %v1383_v21, %v3147_v16 }
 0x270   : > { %v3477_v8 = vpop.permute.xlu1 %1430 }
 0x271   : > { %1930 = vperm.xlu0 %2652, %v2704_v23   ;;  %2651 = vset.pattern.permute.xlu1 %v2778_v47  ;;  %v1399_v54 = vpop.permute.xlu0 %1398 }
 0x272   : > { %2399 = vmatmul.mubr.msk.f32.vlgmr.msra.gmra.mrb[10].mxu1 %vm465_vm0, %v1197_v1  ;;  %1918 = vperm.xlu1 %2651, %v2703_v15   ;;  %v1411_v50 = vmul.f32 %v1399_v54, %v3147_v16 }
 0x274   : > { %v3479_v40 = vpop.permute.xlu1 %1526 }
 0x275   : > { %v3530_v6 = vpop.permute.xlu0 %1542 }
 0x276   : > { %2653 = vset.pattern.permute.xlu1 %v2777_v58 }
 0x277   : > { %1886 = vperm.xlu1 %2653, %v2702_v25  }
 0x278   : > { %v3481_v49 = vpop.permute.xlu1 %1530 }
 0x279   : > { %v1479_v63 = vpop.permute.xlu0 %1478 }
 0x27b   : > { %2654 = vset.pattern.permute.xlu1 %v2778_v47 }
 0x27c   : > { %v3483_v17 = vpop.permute.xlu1 %1394  ;;  %1922 = vperm.xlu1 %2654, %v2705_v51  }
 0x27d   : > { %v3534_v18 = vpop.permute.xlu0 %1486 }
 0x280   : > { %v3485_v4 = vpop.permute.xlu1 %1482  ;;  %2655 = vset.pattern.permute.xlu1 %v2777_v58  ;;  %v1361_v58 = vmul.f32 %v3355_v29, %v3143_v9 }
 0x281   : > { %1890 = vperm.xlu1 %2655, %v2704_v23  }
 0x284   : > { %v1311_v7 = vpop.permute.xlu1 %1310 }
 0x285   : > { %1894 = vperm.xlu1 %2655, %v2706_v36   ;;  %v1323_v45 = vadd.f32 %v1311_v7, %v3473_v33 }
 0x287   : > { %v1371_v33 = vadd.f32 %v1363_v2, %v1323_v45 }
 0x288   : > { %v1315_v41 = vpop.permute.xlu1 %1314 }
 0x289   : > { %2656 = vset.pattern.permute.xlu1 %v2778_v47  ;;  %v1324_v1 = vadd.f32 %v3471_v34, %v1315_v41  ;;  %v3546_v47 = vpop.permute.xlu0 %1494  ;;  %v1369_v34 = vadd.f32 %v1361_v58, %v3467_v28  ;;  %v1419_v23 = vadd.f32 %v1411_v50, %v1371_v33 }
 0x28a   : > { %1934 = vperm.xlu1 %2656, %v2706_v36  }
 0x28b   : > { %v1417_v15 = vadd.f32 %v1409_v44, %v1369_v34 }
 0x28c   : > { %v1355_v35 = vpop.permute.xlu1 %1354 }
 0x28d   : > { %v1364_v52 = vmul.f32 %v1355_v35, %v3143_v9  ;;  %v1415_v35 = vadd.f32 %v1407_v56, %v3456_v38  ;;  %v1410_v38 = vmul.f32 %v3483_v17, %v3147_v16  ;;  %v1503_v51 = vpop.permute.xlu0 %1502 }
 0x28f   : > { %v1372_v7 = vadd.f32 %v1364_v52, %v1324_v1 }
 0x290   : > { %v3497_v22 = vpop.permute.xlu1 %1438 }
 0x294   : > { %v3509_v62 = vpop.permute.xlu1 %1534 }
 0x298   : > { %v3516_v42 = vpop.permute.xlu1 %1538 }
 0x29c   : > { %v1403_v32 = vpop.permute.xlu1 %1402 }
 0x29d   : > { %v1412_v9 = vmul.f32 %v1403_v32, %v3147_v16 }
 0x29f   : > { %v1420_v32 = vadd.f32 %v1412_v9, %v1372_v7 }
 0x2a0   : > { %v3524_v19 = vpop.permute.xlu1 %1490 }
 0x2a4   : > { %v1447_v60 = vpop.permute.xlu1 %1446 }
 0x2a8   : > { %v1451_v53 = vpop.permute.xlu1 %1450 }
 0x2ac   : > { %v3532_v61 = vpop.permute.xlu1 %1546 }
 0x2b0   : > { %v1499_v48 = vpop.permute.xlu1 %1498 }
 0x2b4   : > { %v1551_v37 = vpop.permute.xlu1 %1550 }
 0x2b8   : > { %v1555_v25 = vpop.permute.xlu1 %1554 }
 0x345   : > { %v2400_v39 = vpop.f32.mrb[10].mxu1 }
 0x346   : > { %v1270_v20 = vpop.f32.mrb[11].mxu1 }
 0x347   : > { %v1278_v29 = vadd.f32 %v1270_v20, %v3475_v27  ;;  %v3702_v27 = vsub.s32 1, %v3134_v3 }
 0x349   : > { %v3553_v41 = vadd.f32 %v3369_v46, %v1278_v29 }
 0x34b   : > { %v1456_v10 = vrot.slane %v3553_v41, %v749_v5  ;;  %v3562_v26 = vrot.slane %v3553_v41, %v3702_v27  ;;  %v3565_v28 = vrot.slane %v3553_v41, %v1559_v55  ;;  %v2039_v24 = vmul.f32 %v3553_v41, %v3553_v41 }
 0x34d   : > { %v2041_v5 = vsel %vm2040_vm1, %v2039_v24, 0.0  ;;  %v1463_v21 = vmul.f32 %v1456_v10, %v1447_v60  ;;  %v1515_v3 = vmul.f32 %v3562_v26, %v1499_v48  ;;  %v1567_v11 = vmul.f32 %v3565_v28, %v1551_v37 }
 0x34e   : > { %v2042_v36 = vrot.slane %v2041_v5, 4  ;;  %v1464_v54 = vmul.f32 %v1456_v10, %v1451_v53  ;;  %v1516_v58 = vmul.f32 %v3562_v26, %v1503_v51  ;;  %v1568_v2 = vmul.f32 %v3565_v28, %v1555_v25 }
 0x34f   : > { %v1471_v1 = vadd.f32 %v1463_v21, %v1419_v23  ;;  %v1457_v45 = vmul.f32 %v1456_v10, %v3421_v43  ;;  %v1458_v16 = vmul.f32 %v1456_v10, %v3431_v12  ;;  %v1509_v17 = vmul.f32 %v3562_v26, %v3460_v31 }
 0x350   : > { %v2043_v52 = vadd.f32 %v2042_v36, %v2041_v5  ;;  %v1472_v60 = vadd.f32 %v1464_v54, %v1420_v32  ;;  %v1510_v48 = vmul.f32 %v3562_v26, %v1479_v63  ;;  %v1561_v39 = vmul.f32 %v3565_v28, %v3479_v40 }
 0x351   : > { %v1523_v53 = vadd.f32 %v1515_v3, %v1471_v1  ;;  %v1465_v37 = vadd.f32 %v1457_v45, %v3409_v57  ;;  %v1466_v56 = vadd.f32 %v1458_v16, %v3414_v0  ;;  %v1562_v43 = vmul.f32 %v3565_v28, %v3481_v49 }
 0x352   : > { %v2044_v20 = vrot.slane %v2043_v52, 2  ;;  %v1524_v12 = vadd.f32 %v1516_v58, %v1472_v60  ;;  %v1459_v44 = vmul.f32 %v1456_v10, %v3477_v8  ;;  %v1460_v31 = vmul.f32 %v1456_v10, %v3514_v59 }
 0x353   : > { %v1575_v50 = vadd.f32 %v1567_v11, %v1523_v53  ;;  %v1517_v29 = vadd.f32 %v1509_v17, %v1465_v37  ;;  %v1518_v63 = vadd.f32 %v1510_v48, %v1466_v56  ;;  %v1511_v40 = vmul.f32 %v3562_v26, %v3485_v4 }
 0x354   : > { %v2045_v55 = vadd.f32 %v2044_v20, %v2043_v52  ;;  %v1576_v34 = vadd.f32 %v1568_v2, %v1524_v12  ;;  %v1467_v57 = vadd.f32 %v1459_v44, %v1415_v35  ;;  %v1468_v0 = vadd.f32 %v1460_v31, %v3458_v14  ;;  %v2708_v20 = vld [vmem:[%s2898_s22 + $0x38] sm:$0xff]  ;;  %v2709_v31 = vld [vmem:[%s2898_s22] sm:$0xff] }
 0x355   : > { %v1583_v33 = vmul.f32 0.5, %v1575_v50  ;;  %v1569_v7 = vadd.f32 %v1561_v39, %v1517_v29  ;;  %v1570_v49 = vadd.f32 %v1562_v43, %v1518_v63  ;;  %v1512_v9 = vmul.f32 %v3562_v26, %v3534_v18  ;;  %v2707_v39 = vld [vmem:[%s2898_s22 + $0x30] sm:$0xff]  ;;  %v2710_v63 = vld [vmem:[%s2898_s22 + $0x8] sm:$0xff] }
 0x356   : > { %v2046_v8 = vrot.slane %v2045_v55, 1  ;;  %v1584_v27 = vmul.f32 0.5, %v1576_v34  ;;  %v1519_v59 = vadd.f32 %v1511_v40, %v1467_v57  ;;  %v1563_v24 = vmul.f32 %v3565_v28, %v3509_v62 }
 0x357   : > { %2675 = vtanh.f32 %v1583_v33  ;;  %v1577_v25 = vmul.f32 0.5, %v1569_v7  ;;  %v1578_v4 = vmul.f32 0.5, %v1570_v49  ;;  %v1520_v23 = vadd.f32 %v1512_v9, %v1468_v0  ;;  %v2711_v7 = vld [vmem:[%s2898_s22 + $0x10] sm:$0xff]  ;;  %v2712_v9 = vld [vmem:[%s2898_s22 + $0x18] sm:$0xff] }
 0x358   : > { %v2047_v32 = vadd.f32 %v2046_v8, %v2045_v55  ;;  %2677 = vtanh.f32 %v1584_v27  ;;  %v1564_v14 = vmul.f32 %v3565_v28, %v3516_v42  ;;  %v1571_v35 = vadd.f32 %v1563_v24, %v1519_v59 }
 0x359   : > { %v1418_v51 = vadd.f32 %v1410_v38, %v3469_v30  ;;  %2679 = vtanh.f32 %v1577_v25  ;;  %v1461_v18 = vmul.f32 %v1456_v10, %v3497_v22  ;;  %v1462_v5 = vmul.f32 %v1456_v10, %v3519_v13 }
 0x35a   : > { %v2048_v21 = vmax.f32 %v2047_v32, 1e-24  ;;  %2681 = vtanh.f32 %v1578_v4  ;;  %v1572_v62 = vadd.f32 %v1564_v14, %v1520_v23  ;;  %v1579_v3 = vmul.f32 0.5, %v1571_v35  ;;  %v2713_v32 = vld [vmem:[%s2898_s22 + $0x20] sm:$0xff]  ;;  %v2714_v35 = vld [vmem:[%s2898_s22 + $0x28] sm:$0xff] }
 0x35b   : > { %v1469_v11 = vadd.f32 %v1461_v18, %v1417_v15  ;;  %v1470_v36 = vadd.f32 %v1462_v5, %v1418_v51  ;;  %v1513_v54 = vmul.f32 %v3562_v26, %v3524_v19  ;;  %v1514_v42 = vmul.f32 %v3562_v26, %v3546_v47  ;;  %v1618_v5 = vld [vmem:[%s3695_s3 + $0x58] sm:$0xff] }
 0x35c   : > { %2683 = vrsqrt.f32 %v2048_v21  ;;  %v1580_v58 = vmul.f32 0.5, %v1572_v62  ;;  %v1565_v30 = vmul.f32 %v3565_v28, %v3530_v6  ;;  %v1566_v10 = vmul.f32 %v3565_v28, %v3532_v61  ;;  %v1619_v21 = vld [vmem:[%s3695_s3 + $0x60] sm:$0xff]  ;;  %v1620_v62 = vld [vmem:[%s3695_s3 + $0x68] sm:$0xff] }
 0x35d   : > { %2685 = vtanh.f32 %v1579_v3  ;;  %v1521_v22 = vadd.f32 %v1513_v54, %v1469_v11  ;;  %v1522_v13 = vadd.f32 %v1514_v42, %v1470_v36  ;;  %v1621_v3 = vld [vmem:[%s3695_s3 + $0x70] sm:$0xff]  ;;  %v1622_v11 = vld [vmem:[%s3695_s3 + $0x78] sm:$0xff]  ;;  %v1623_v36 = vld [vmem:[%s3695_s3 + $0x80] sm:$0xff] }
 0x35e   : > { %2687 = vtanh.f32 %v1580_v58  ;;  %v1624_v54 = vld [vmem:[%s3695_s3 + $0x88] sm:$0xff]  ;;  %v1625_v42 = vld [vmem:[%s3695_s3 + $0x90] sm:$0xff] }
 0x35f   : > { %v1573_v15 = vadd.f32 %v1565_v30, %v1521_v22  ;;  %v1574_v38 = vadd.f32 %v1566_v10, %v1522_v13  ;;  %v1953_v58 = vld [vmem:[%s3696_s4 + $0x10] sm:$0xff]  ;;  %v1626_v30 = vld [vmem:[%s3695_s3 + $0x98] sm:$0xff]  ;;  %v1773_v22 = vpop.permute.xlu0 %1772  ;;  %v1777_v13 = vpop.permute.xlu1 %1776 }
 0x360   : > { %2448 = vmatprep.mubr.msk.f32.mxu1 %vm465_vm0, %v1953_v58 }
 0x361   : > { %v2676_v2 = vpop.eup %2675  ;;  %v1581_v19 = vmul.f32 0.5, %v1573_v15  ;;  %v1582_v1 = vmul.f32 0.5, %v1574_v38 }
 0x362   : > { %v2678_v47 = vpop.eup %2677  ;;  %v1599_v26 = vadd.f32 1.0, %v2676_v2 }
 0x363   : > { %v2680_v45 = vpop.eup %2679  ;;  %v1600_v16 = vadd.f32 1.0, %v2678_v47  ;;  %2689 = vtanh.f32 %v1581_v19  ;;  %v1781_v15 = vpop.permute.xlu0 %1780 }
 0x364   : > { %v2682_v6 = vpop.eup %2681  ;;  %v1607_v17 = vmul.f32 0.5, %v1599_v26  ;;  %v1593_v52 = vadd.f32 1.0, %v2680_v45  ;;  %2691 = vtanh.f32 %v1582_v1  ;;  %v1785_v1 = vpop.permute.xlu1 %1784 }
 0x365   : > { %v1608_v61 = vmul.f32 0.5, %v1600_v16  ;;  %v1594_v28 = vadd.f32 1.0, %v2682_v6 }
 0x366   : > { %v2684_v60 = vpop.eup %2683  ;;  %v1601_v48 = vmul.f32 0.5, %v1593_v52  ;;  %v1615_v53 = vmul.f32 %v2707_v39, %v1607_v17 }
 0x367   : > { %v2686_v37 = vpop.eup %2685  ;;  %v2061_v56 = vmul.f32 %v2684_v60, %v3553_v41  ;;  %v1602_v43 = vmul.f32 0.5, %v1594_v28  ;;  %v1616_v12 = vmul.f32 %v2708_v20, %v1608_v61  ;;  %v1789_v6 = vpop.permute.xlu0 %1788 }
 0x368   : > { %v2688_v44 = vpop.eup %2687  ;;  %v1609_v50 = vmul.f32 %v2709_v31, %v1601_v48  ;;  %v1595_v29 = vadd.f32 1.0, %v2686_v37  ;;  %v1793_v60 = vpop.permute.xlu1 %1792 }
 0x369   : > { %v1610_v40 = vmul.f32 %v2710_v63, %v1602_v43  ;;  %v1596_v55 = vadd.f32 1.0, %v2688_v44  ;;  %v2511_v34 = vpack.c.bf16 %v1616_v12, %v1615_v53  ;;  %2062 = vst [vmem:[%s3613_s21] sm:$0x7] %v2061_v56 }
 0x36a   : > { %v1603_v57 = vmul.f32 0.5, %v1595_v29 }
 0x36b   : > { %v2499_v0 = vpack.c.bf16 %v1610_v40, %v1609_v50  ;;  %v1604_v33 = vmul.f32 0.5, %v1596_v55  ;;  %v1797_v43 = vpop.permute.xlu0 %1796 }
 0x36c   : > { %v1611_v41 = vmul.f32 %v2711_v7, %v1603_v57  ;;  %v1801_v31 = vpop.permute.xlu1 %1800 }
 0x36d   : > { %v2690_v49 = vpop.eup %2689  ;;  %2500 = vmatprep.subr.bf16.mxu0 %v2499_v0  ;;  %v1612_v8 = vmul.f32 %v2712_v9, %v1604_v33 }
 0x36e   : > { %v2692_v27 = vpop.eup %2691  ;;  %2502 = vmatpush3.bf16.msra.mxu0 %v2499_v0  ;;  %v1597_v59 = vadd.f32 1.0, %v2690_v49 }
 0x36f   : > { %v2503_v24 = vpack.c.bf16 %v1612_v8, %v1611_v41  ;;  %v1598_v25 = vadd.f32 1.0, %v2692_v27 }
 0x370   : > { %v1605_v4 = vmul.f32 0.5, %v1597_v59  ;;  %v1871_v33 = vpop.permute.xlu1 %1870 }
 0x371   : > { %2504 = vmatprep.subr.bf16.mxu0 %v2503_v24  ;;  %v1606_v23 = vmul.f32 0.5, %v1598_v25 }
 0x372   : > { %2506 = vmatpush3.bf16.msra.mxu0 %v2503_v24  ;;  %v1613_v14 = vmul.f32 %v2713_v32, %v1605_v4 }
 0x373   : > { %v1614_v51 = vmul.f32 %v2714_v35, %v1606_v23 }
 0x374   : > { %v1907_v59 = vpop.permute.xlu1 %1906 }
 0x375   : > { %v2507_v18 = vpack.c.bf16 %v1614_v51, %v1613_v14 }
 0x377   : > { %2508 = vmatprep.subr.bf16.mxu0 %v2507_v18 }
 0x378   : > { %2510 = vmatpush3.bf16.msra.mxu0 %v2507_v18  ;;  %v1875_v18 = vpop.permute.xlu1 %1874 }
 0x379   : > { %2512 = vmatprep.subr.bf16.mxu0 %v2511_v34 }
 0x37c   : > { %2514 = vmatpush3.bf16.msra.mxu0 %v2511_v34 }
 0x37f   : > { %2418 = vmatmul.mubr.msk.f32.vlgmr.msra.gmra.mrb[16].mxu0 %vm465_vm0, %v1618_v5 }
 0x380   : > { %2420 = vmatprep.mubr.msk.f32.mxu0 %vm465_vm0, %v1619_v21 }
 0x383   : > { %2421 = vmatmul.mubr.msk.f32.gmra.mrb[18].mxu0 %vm465_vm0, %v1620_v62 }
 0x384   : > { %2423 = vmatprep.mubr.msk.f32.mxu0 %vm465_vm0, %v1621_v3 }
 0x387   : > { %2424 = vmatmul.mubr.msk.f32.gmra.mrb[20].mxu0 %vm465_vm0, %v1622_v11 }
 0x388   : > { %2426 = vmatprep.mubr.msk.f32.mxu0 %vm465_vm0, %v1623_v36 }
 0x38b   : > { %2427 = vmatmul.mubr.msk.f32.gmra.mrb[22].mxu0 %vm465_vm0, %v1624_v54  ;;  %v1879_v54 = vpop.permute.xlu1 %1878 }
 0x38c   : > { %2429 = vmatprep.mubr.msk.f32.mxu0 %vm465_vm0, %v1625_v42 }
 0x38f   : > { %2430 = vmatmul.mubr.msk.f32.gmra.mrb[24].mxu0 %vm465_vm0, %v1626_v30 }
 0x452   : > { %v2419_v10 = vpop.f32.mrb[16].mxu0 }
 0x453   : > { %v1804_v38 = vadd.f32 %v2419_v10, %v1777_v13  ;;  %v1723_v2 = vpop.f32.mrb[17].mxu0  ;;  %v1867_v10 = vpop.permute.xlu0 %1866 }
 0x454   : > { %v1803_v19 = vadd.f32 %v1773_v22, %v1723_v2 }
 0x456   : > { %v1811_v47 = vadd.f32 %v1804_v38, %v1803_v19  ;;  %v2422_v26 = vpop.f32.mrb[18].mxu0 }
 0x457   : > { %v1733_v45 = vpop.f32.mrb[19].mxu0  ;;  %v1806_v52 = vadd.f32 %v2422_v26, %v1785_v1  ;;  %v1883_v1 = vpop.permute.xlu0 %1882 }
 0x458   : > { %v1805_v16 = vadd.f32 %v1781_v15, %v1733_v45  ;;  %v1919_v15 = vpop.permute.xlu1 %1918 }
 0x45a   : > { %v1812_v17 = vadd.f32 %v1811_v47, %v1805_v16  ;;  %v2425_v61 = vpop.f32.mrb[20].mxu0 }
 0x45b   : > { %v1743_v28 = vpop.f32.mrb[21].mxu0  ;;  %v1808_v37 = vadd.f32 %v2425_v61, %v1793_v60 }
 0x45c   : > { %v1813_v48 = vadd.f32 %v1812_v17, %v1806_v52  ;;  %v1807_v39 = vadd.f32 %v1789_v6, %v1743_v28  ;;  %v1887_v47 = vpop.permute.xlu1 %1886  ;;  %v1911_v6 = vpop.permute.xlu0 %1910 }
 0x45e   : > { %v1814_v53 = vadd.f32 %v1813_v48, %v1807_v39  ;;  %v2428_v56 = vpop.f32.mrb[22].mxu0 }
 0x45f   : > { %v1753_v20 = vpop.f32.mrb[23].mxu0  ;;  %v1810_v29 = vadd.f32 %v2428_v56, %v1801_v31 }
 0x460   : > { %v1815_v12 = vadd.f32 %v1814_v53, %v1808_v37  ;;  %v1809_v44 = vadd.f32 %v1797_v43, %v1753_v20  ;;  %v1923_v17 = vpop.permute.xlu1 %1922  ;;  %v1915_v28 = vpop.permute.xlu0 %1914 }
 0x462   : > { %v1816_v50 = vadd.f32 %v1815_v12, %v1809_v44 }
 0x464   : > { %v1817_v63 = vadd.f32 %v1816_v50, %v1810_v29  ;;  %v1891_v60 = vpop.permute.xlu1 %1890  ;;  %v1927_v48 = vpop.permute.xlu0 %1926 }
 0x466   : > { %v1818_v40 = vrot.slane %v1817_v63, 4 }
 0x468   : > { %v1819_v55 = vadd.f32 %v1818_v40, %v1817_v63 }
 0x46a   : > { %v1820_v34 = vrot.slane %v1819_v55, 2 }
 0x46c   : > { %v1821_v57 = vadd.f32 %v1820_v34, %v1819_v55  ;;  %v1931_v34 = vpop.permute.xlu0 %1930 }
 0x46e   : > { %v1822_v0 = vrot.slane %v1821_v57, 1 }
 0x470   : > { %v1823_v7 = vadd.f32 %v1822_v0, %v1821_v57 }
 0x472   : > { %v1824_v41 = vmul.f32 0.015625, %v1823_v7 }
 0x474   : > { %v1827_v49 = vsub.f32 %v1805_v16, %v1824_v41  ;;  %v1828_v9 = vsub.f32 %v1806_v52, %v1824_v41  ;;  %v1832_v8 = vsub.f32 %v1810_v29, %v1824_v41  ;;  %v1825_v27 = vsub.f32 %v1803_v19, %v1824_v41 }
 0x475   : > { %v1826_v24 = vsub.f32 %v1804_v38, %v1824_v41  ;;  %v1829_v25 = vsub.f32 %v1807_v39, %v1824_v41  ;;  %v1830_v4 = vsub.f32 %v1808_v37, %v1824_v41  ;;  %v1831_v23 = vsub.f32 %v1809_v44, %v1824_v41  ;;  %v1895_v39 = vpop.permute.xlu1 %1894 }
 0x476   : > { %v1833_v32 = vmul.f32 %v1825_v27, %v1825_v27  ;;  %v1835_v35 = vmul.f32 %v1827_v49, %v1827_v49  ;;  %v1836_v5 = vmul.f32 %v1828_v9, %v1828_v9  ;;  %v1840_v30 = vmul.f32 %v1832_v8, %v1832_v8 }
 0x477   : > { %v1834_v14 = vmul.f32 %v1826_v24, %v1826_v24  ;;  %v1837_v62 = vmul.f32 %v1829_v25, %v1829_v25  ;;  %v1838_v11 = vmul.f32 %v1830_v4, %v1830_v4  ;;  %v1839_v42 = vmul.f32 %v1831_v23, %v1831_v23 }
 0x479   : > { %v1841_v51 = vadd.f32 %v1834_v14, %v1833_v32  ;;  %v1935_v57 = vpop.permute.xlu1 %1934 }
 0x47b   : > { %v1842_v21 = vadd.f32 %v1841_v51, %v1835_v35 }
 0x47d   : > { %v1843_v3 = vadd.f32 %v1842_v21, %v1836_v5 }
 0x47f   : > { %v1844_v36 = vadd.f32 %v1843_v3, %v1837_v62 }
 0x481   : > { %v1845_v58 = vadd.f32 %v1844_v36, %v1838_v11 }
 0x483   : > { %v1846_v22 = vadd.f32 %v1845_v58, %v1839_v42  ;;  %v2431_v42 = vpop.f32.mrb[24].mxu0 }
 0x484   : > { %v1763_v58 = vpop.f32.mrb[25].mxu0 }
 0x485   : > { %v1847_v13 = vadd.f32 %v1846_v22, %v1840_v30 }
 0x487   : > { %v1848_v38 = vrot.slane %v1847_v13, 4 }
 0x489   : > { %v1849_v2 = vadd.f32 %v1848_v38, %v1847_v13  ;;  %v2036_v13 = vrot.slane %v3369_v46, 3 }
 0x48b   : > { %v1850_v19 = vrot.slane %v1849_v2, 2 }
 0x48d   : > { %v1851_v26 = vadd.f32 %v1850_v19, %v1849_v2 }
 0x48f   : > { %v1852_v45 = vrot.slane %v1851_v26, 1 }
 0x491   : > { %v1853_v16 = vadd.f32 %v1852_v45, %v1851_v26 }
 0x493   : > { %v1854_v52 = vmul.f32 0.015625, %v1853_v16 }
 0x495   : > { %v1855_v61 = vadd.f32 1e-05, %v1854_v52 }
 0x497   : > { %2693 = vrsqrt.f32 %v1855_v61 }
 0x4a1   : > { %v2694_v53 = vpop.eup %2693 }
 0x4a2   : > { %v1858_v37 = vmul.f32 %v2694_v53, %v1826_v24  ;;  %v1859_v56 = vmul.f32 %v2694_v53, %v1827_v49  ;;  %v1860_v43 = vmul.f32 %v2694_v53, %v1828_v9  ;;  %v1857_v20 = vmul.f32 %v2694_v53, %v1825_v27 }
 0x4a3   : > { %v1861_v12 = vmul.f32 %v2694_v53, %v1829_v25  ;;  %v1862_v44 = vmul.f32 %v2694_v53, %v1830_v4  ;;  %v1863_v31 = vmul.f32 %v2694_v53, %v1831_v23  ;;  %v1864_v50 = vmul.f32 %v2694_v53, %v1832_v8 }
 0x4a4   : > { %v1898_v29 = vmul.f32 %v1871_v33, %v1858_v37  ;;  %v1899_v63 = vmul.f32 %v1875_v18, %v1859_v56  ;;  %v1900_v40 = vmul.f32 %v1879_v54, %v1860_v43  ;;  %v1897_v55 = vmul.f32 %v1867_v10, %v1857_v20 }
 0x4a5   : > { %v1901_v0 = vmul.f32 %v1883_v1, %v1861_v12  ;;  %v1902_v7 = vmul.f32 %v1887_v47, %v1862_v44  ;;  %v1903_v41 = vmul.f32 %v1891_v60, %v1863_v31  ;;  %v1904_v32 = vmul.f32 %v1895_v39, %v1864_v50 }
 0x4a6   : > { %v1937_v14 = vadd.f32 %v1907_v59, %v1897_v55  ;;  %v1940_v35 = vadd.f32 %v1919_v15, %v1900_v40  ;;  %v1938_v24 = vadd.f32 %v1911_v6, %v1898_v29  ;;  %v1939_v49 = vadd.f32 %v1915_v28, %v1899_v63  ;;  %v1954_v59 = vld [vmem:[%s3696_s4 + $0x18] sm:$0xff] }
 0x4a7   : > { %v1941_v9 = vadd.f32 %v1923_v17, %v1901_v0  ;;  %v1942_v27 = vadd.f32 %v1927_v48, %v1902_v7  ;;  %v1943_v25 = vadd.f32 %v1931_v34, %v1903_v41  ;;  %v1944_v4 = vadd.f32 %v1935_v57, %v1904_v32 }
 0x4a8   : > { %v1945_v23 = vmax.f32 %v1937_v14, 0.0  ;;  %v1948_v8 = vmax.f32 %v1940_v35, 0.0  ;;  %v1946_v33 = vmax.f32 %v1938_v24, 0.0  ;;  %v1947_v51 = vmax.f32 %v1939_v49, 0.0 }
 0x4a9   : > { %v1949_v18 = vmax.f32 %v1941_v9, 0.0  ;;  %v1950_v5 = vmax.f32 %v1942_v27, 0.0  ;;  %v1951_v21 = vmax.f32 %v1943_v25, 0.0  ;;  %v1952_v62 = vmax.f32 %v1944_v4, 0.0 }
 0x4aa   : > { %v2515_v3 = vpack.c.bf16 %v1946_v33, %v1945_v23  ;;  %v2519_v11 = vpack.c.bf16 %v1948_v8, %v1947_v51 }
 0x4ab   : > { %v2523_v36 = vpack.c.bf16 %v1950_v5, %v1949_v18  ;;  %v2527_v54 = vpack.c.bf16 %v1952_v62, %v1951_v21 }
 0x4ac   : > { %2516 = vmatprep.subr.bf16.mxu1 %v2515_v3 }
 0x4ad   : > { %2518 = vmatpush3.bf16.msra.mxu1 %v2515_v3 }
 0x4ae   : > { %2520 = vmatprep.subr.bf16.mxu1 %v2519_v11 }
 0x4b1   : > { %2522 = vmatpush3.bf16.msra.mxu1 %v2519_v11 }
 0x4b2   : > { %2524 = vmatprep.subr.bf16.mxu1 %v2523_v36 }
 0x4b5   : > { %2526 = vmatpush3.bf16.msra.mxu1 %v2523_v36 }
 0x4b6   : > { %2528 = vmatprep.subr.bf16.mxu1 %v2527_v54 }
 0x4b9   : > { %2530 = vmatpush3.bf16.msra.mxu1 %v2527_v54 }
 0x4bc   : > { %2449 = vmatmul.mubr.msk.f32.vlgmr.msra.gmra.mrb[12].mxu1 %vm465_vm0, %v1954_v59 }
 0x58f   : > { %v2450_v30 = vpop.f32.mrb[12].mxu1 }
 0x590   : > { %v2027_v22 = vpop.f32.mrb[13].mxu1 }
 0x591   : > { %v2035_v10 = vadd.f32 %v2027_v22, %v1763_v58 }
 0x593   : > { %v2038_v15 = vadd.f32 %v2036_v13, %v2035_v10 }
 0x595   : > { %v2050_v38 = vmul.f32 %v2038_v15, %v2038_v15  ;;  %v2065_v2 = vmul.f32 0.5, %v2038_v15 }
 0x597   : > { %v2052_v19 = vsel %vm2051_vm2, %v2050_v38, 0.0  ;;  %2695 = vtanh.f32 %v2065_v2 }
 0x598   : > { %v2053_v1 = vrot.slane %v2052_v19, 4 }
 0x59a   : > { %v2054_v47 = vadd.f32 %v2053_v1, %v2052_v19 }
 0x59c   : > { %v2055_v26 = vrot.slane %v2054_v47, 2 }
 0x59e   : > { %v2056_v45 = vadd.f32 %v2055_v26, %v2054_v47 }
 0x5a0   : > { %v2057_v16 = vrot.slane %v2056_v45, 1 }
 0x5a1   : > { %v2696_v6 = vpop.eup %2695 }
 0x5a2   : > { %v2058_v17 = vadd.f32 %v2057_v16, %v2056_v45  ;;  %v2067_v52 = vadd.f32 1.0, %v2696_v6 }
 0x5a4   : > { %v2059_v61 = vmax.f32 %v2058_v17, 1e-24  ;;  %v2068_v28 = vmul.f32 0.5, %v2067_v52 }
 0x5a6   : > { %2697 = vrsqrt.f32 %v2059_v61  ;;  %2069 = vst [vmem:[%s3613_s21 + $0x3] sm:$0xc] %v2068_v28 }
 0x5b0   : > { %v2698_v46 = vpop.eup %2697 }
 0x5b1   : > { %v2063_v60 = vmul.f32 %v2698_v46, %v2038_v15 }
 0x5b3   : > { %2064 = vst [vmem:[%s3613_s21 + $0x3] sm:$0x3] %v2063_v60 }
 0x5b4 PF: > { %s18_s11 = sadd.s32 1, %s2769_s11   ;;  %s3703_s27 = smov %s2749_s28 }
 0x5b5   : > { %p15_p12 = scmp.ge.s32.totalorder %s18_s11, 6   ;;  %s3704_s28 = smov %s2875_s18 }
 0x5b6   : > { %s3705_s29 = smov %s2761_s9  ;;  %s3706_s30 = smov %s2765_s10 }
 0x5b7   : > { %s3707_s9 = smov %s3710_s12  ;;  %s3708_s10 = smov %s3714_s13 }
 0x5b8   :  { %17 = sbr.rel (!%p15_p12) target bundleno = 4 (0x4), region = 128 }

</bundles_post_ra>
